<compile_context>
chip_gen: v7x
topology: tpu7x:2x2x1
jax: 0.10.0
libtpu: 0.0.40
codegen_flags: <defaults>
</compile_context>

<pallas_src>
import functools

import jax
import jax.numpy as jnp
from jax.experimental import pallas as pl
from jax.experimental.pallas import tpu as pltpu

FP = 128        # lane-dense padded feature width
NP_ALIGN = 128  # node-row padding (full-K MXU feed, unmasked vregs)


def _round_up(v, m):
    return (v + m - 1) // m * m


# ----------------------------------------------------------------------------
# Fused kernel (all layers in one body; unrolled at trace time)
# ----------------------------------------------------------------------------
def make_fused_sage_kernel(num_layers, out_channels):
    """Ref layout: (a, x, wl_0, wr_0, b_0, ..., wl_{L-1}, wr_{L-1}, b_{L-1}, out).

    a    : [Np, Np]  f32   row-normalized adjacency (f32 keeps 1/deg exact-ish)
    x    : [Np, FP]  bf16  zero-padded node features
    wl_l : [FP, FP]  bf16  lin_l weight * bn_scale, zero-padded
    wr_l : [FP, FP]  bf16  lin_r weight * bn_scale, zero-padded
    b_l  : [1, FP]   f32   folded bias, zero-padded
    out  : [Np, FP]  f32   log-softmax (columns >= out_channels are junk)
    """

    def kernel(a_ref, x_ref, *refs):
        o_ref = refs[-1]
        a = a_ref[...]
        x = x_ref[...]
        for layer in range(num_layers):
            wl = refs[3 * layer][...]
            wr = refs[3 * layer + 1][...]
            b = refs[3 * layer + 2][...]
            # Mean neighbor aggregation on the MXU (f32 A, f32 accumulate).
            agg = jnp.dot(a, x.astype(jnp.float32),
                          preferred_element_type=jnp.float32)
            # Two MXU dots replace concat + one wide dot (no lane-axis copy).
            h = (jnp.dot(agg.astype(jnp.bfloat16), wl,
                         preferred_element_type=jnp.float32)
                 + jnp.dot(x, wr, preferred_element_type=jnp.float32)
                 + b)
            if layer < num_layers - 1:
                # BatchNorm (eval) already folded into wl/wr/b; ReLU; dropout=id.
                x = jnp.maximum(h, 0.0).astype(jnp.bfloat16)
            else:
                # Mask padded logit columns, then stable log_softmax (f32).
                col = jax.lax.broadcasted_iota(jnp.int32, h.shape, 1)
                h = jnp.where(col < out_channels, h, -1e30)
                m = jnp.max(h, axis=-1, keepdims=True)
                shifted = h - m
                lse = jnp.log(jnp.sum(jnp.exp(shifted), axis=-1, keepdims=True))
                o_ref[...] = shifted - lse

    return kernel


# ----------------------------------------------------------------------------
# One-time packing (hoisted out of the per-call path)
# ----------------------------------------------------------------------------
def pack_sage_params(convs, bns):
    """Fold eval-mode BN into conv weights/bias, pad lane-dense, cast bf16."""
    num_layers = len(convs)
    packed = []
    for layer, (wl, wr, b) in enumerate(convs):
        fi, fo = wl.shape
        if layer < num_layers - 1:
            scale, shift = bns[layer]      # [1, fo]
            wl = wl * scale
            wr = wr * scale
            b = b * scale + shift
        wl_p = jnp.zeros((FP, FP), jnp.float32).at[:fi, :fo].set(wl)
        wr_p = jnp.zeros((FP, FP), jnp.float32).at[:fi, :fo].set(wr)
        b_p = jnp.zeros((1, FP), jnp.float32).at[:, :fo].set(b)
        packed.append(wl_p.astype(jnp.bfloat16))
        packed.append(wr_p.astype(jnp.bfloat16))
        packed.append(b_p)                 # bias stays f32
    return tuple(packed)


def pack_adjacency(adj):
    """Zero-pad the dense row-normalized adjacency to [Np, Np], Np % 128 == 0."""
    n = adj.shape[0]
    np_ = _round_up(max(n, NP_ALIGN), NP_ALIGN)
    return jnp.zeros((np_, np_), jnp.float32).at[:n, :n].set(adj)


# ----------------------------------------------------------------------------
# Jitted forward: pad features, launch one fused pallas_call
# ----------------------------------------------------------------------------
@functools.partial(jax.jit, static_argnums=(3,))
def sage_forward(x, a_p, packed, out_ch):
    num_layers = len(packed) // 3
    n, in_ch = x.shape
    np_ = a_p.shape[0]

    x_p = jnp.zeros((np_, FP), jnp.bfloat16).at[:n, :in_ch].set(
        x.astype(jnp.bfloat16))

    vmem = pl.BlockSpec(memory_space=pltpu.MemorySpace.VMEM)
    out = pl.pallas_call(
        make_fused_sage_kernel(num_layers, out_ch),
        out_shape=jax.ShapeDtypeStruct((np_, FP), jnp.float32),
        in_specs=[vmem] * (2 + 3 * num_layers),
        out_specs=vmem,
    )(a_p, x_p, *packed)

    return out[:n, :out_ch]


# ----------------------------------------------------------------------------
# Parameter construction + graph helpers (model definition)
# ----------------------------------------------------------------------------
def glorot(key, fan_in, fan_out):
    s = jnp.sqrt(6.0 / (fan_in + fan_out))
    return jax.random.uniform(key, (fan_in, fan_out), jnp.float32, -s, s)


def init_sage_params(key, in_channels, hidden_channels, out_channels,
                     num_layers):
    dims = ([in_channels] + [hidden_channels] * (num_layers - 1)
            + [out_channels])
    convs, bns = [], []
    for layer in range(num_layers):
        fi, fo = dims[layer], dims[layer + 1]
        key, k1, k2 = jax.random.split(key, 3)
        wl = glorot(k1, fi, fo)                  # lin_l weight (transposed)
        wr = glorot(k2, fi, fo)                  # lin_r weight (transposed)
        b = jnp.zeros((1, fo), jnp.float32)      # lin_l bias
        convs.append((wl, wr, b))
        if layer < num_layers - 1:
            # BatchNorm1d defaults: gamma=1, beta=0, mean=0, var=1 (eval mode)
            eps = 1e-5
            gamma = jnp.ones((1, fo), jnp.float32)
            beta = jnp.zeros((1, fo), jnp.float32)
            running_mean = jnp.zeros((1, fo), jnp.float32)
            running_var = jnp.ones((1, fo), jnp.float32)
            scale = gamma / jnp.sqrt(running_var + eps)
            shift = beta - running_mean * scale
            bns.append((scale, shift))
    return convs, bns


def build_norm_adjacency(edge_index, num_nodes):
    """Dense row-normalized adjacency: A[dst, src] = mult / in_degree(dst)."""
    src, dst = edge_index[0], edge_index[1]
    adj = jnp.zeros((num_nodes, num_nodes), jnp.float32)
    adj = adj.at[dst, src].add(1.0)
    deg = jnp.sum(adj, axis=1, keepdims=True)
    return adj / jnp.maximum(deg, 1.0)


def sage_reference(x, adj, convs, bns):
    """Pure-JAX f32 reference for validation."""
    h = x
    for layer, (wl, wr, b) in enumerate(convs):
        agg = adj @ h
        hn = agg @ wl + h @ wr + b
        if layer < len(convs) - 1:
            scale, shift = bns[layer]
            hn = jnp.maximum(hn * scale + shift, 0.0)
        h = hn
    return jax.nn.log_softmax(h, axis=-1)


# ----------------------------------------------------------------------------
if __name__ == "__main__":
    # Small synthetic graph: 64 nodes, 256 directed edges.
    NUM_NODES = 64
    NUM_EDGES = 256
    IN_CH, HID_CH, OUT_CH = 16, 32, 8
    NUM_LAYERS = 3
    DROPOUT = 0.5  # identity in eval mode

    key = jax.random.PRNGKey(0)
    key, kx, ke, kp = jax.random.split(key, 4)

    x = jax.random.normal(kx, (NUM_NODES, IN_CH), jnp.float32)
    edge_index = jax.random.randint(ke, (2, NUM_EDGES), 0, NUM_NODES,
                                    dtype=jnp.int32)
    adj = build_norm_adjacency(edge_index, NUM_NODES)

    convs, bns = init_sage_params(kp, IN_CH, HID_CH, OUT_CH, NUM_LAYERS)

    # One-time packing (BN folding, padding, bf16 casts) outside the jitted
    # per-call path.
    packed = jax.block_until_ready(pack_sage_params(convs, bns))
    a_p = jax.block_until_ready(pack_adjacency(adj))

    out = sage_forward(x, a_p, packed, OUT_CH)
    out = jax.block_until_ready(out)

    assert out.shape == (NUM_NODES, OUT_CH)
    # log_softmax rows should exponentiate to ~1.
    row_sums = jnp.exp(out).sum(axis=-1)
    assert bool(jnp.all(jnp.abs(row_sums - 1.0) < 1e-4))

    # Loose comparison against an f32 reference (bf16 features/weights).
    ref = sage_reference(x, adj, convs, bns)
    max_err = float(jnp.max(jnp.abs(out - ref)))
    assert max_err < 0.3, f"max abs error vs f32 reference: {max_err}"

    print("KERNEL_OK")
</pallas_src>

<mosaic_0001>
module attributes {stable_mosaic.version = 11 : i64} {
  func.func @kernel(%arg0: memref<128x128xf32, #tpu.memory_space<vmem>>, %arg1: memref<128x128xbf16, #tpu.memory_space<vmem>>, %arg2: memref<128x128xbf16, #tpu.memory_space<vmem>>, %arg3: memref<128x128xbf16, #tpu.memory_space<vmem>>, %arg4: memref<1x128xf32, #tpu.memory_space<vmem>>, %arg5: memref<128x128xbf16, #tpu.memory_space<vmem>>, %arg6: memref<128x128xbf16, #tpu.memory_space<vmem>>, %arg7: memref<1x128xf32, #tpu.memory_space<vmem>>, %arg8: memref<128x128xbf16, #tpu.memory_space<vmem>>, %arg9: memref<128x128xbf16, #tpu.memory_space<vmem>>, %arg10: memref<1x128xf32, #tpu.memory_space<vmem>>, %arg11: memref<128x128xf32, #tpu.memory_space<vmem>>) attributes {dimension_semantics = [], scalar_prefetch = 0 : i64, scratch_operands = 0 : i64, tpu.core_type = #tpu.core_type<tc>} {
    %c0 = arith.constant 0 : index
    %c0_0 = arith.constant 0 : index
    %0 = vector.load %arg0[%c0, %c0_0] : memref<128x128xf32, #tpu.memory_space<vmem>>, vector<128x128xf32>
    %c0_1 = arith.constant 0 : index
    %c0_2 = arith.constant 0 : index
    %1 = vector.load %arg1[%c0_1, %c0_2] : memref<128x128xbf16, #tpu.memory_space<vmem>>, vector<128x128xbf16>
    %c0_3 = arith.constant 0 : index
    %c0_4 = arith.constant 0 : index
    %2 = vector.load %arg2[%c0_3, %c0_4] : memref<128x128xbf16, #tpu.memory_space<vmem>>, vector<128x128xbf16>
    %c0_5 = arith.constant 0 : index
    %c0_6 = arith.constant 0 : index
    %3 = vector.load %arg3[%c0_5, %c0_6] : memref<128x128xbf16, #tpu.memory_space<vmem>>, vector<128x128xbf16>
    %c0_7 = arith.constant 0 : index
    %c0_8 = arith.constant 0 : index
    %4 = vector.load %arg4[%c0_7, %c0_8] : memref<1x128xf32, #tpu.memory_space<vmem>>, vector<1x128xf32>
    %5 = arith.extf %1 : vector<128x128xbf16> to vector<128x128xf32>
    %cst = arith.constant dense<0.000000e+00> : vector<128x128xf32>
    %6 = tpu.matmul %0, %5, %cst {dimension_numbers = #tpu.dot_dimension_numbers<[1], [0], [0], [1], [0, 0, 1, 1], [], []>} : vector<128x128xf32>, vector<128x128xf32>, vector<128x128xf32> -> vector<128x128xf32>
    %7 = arith.truncf %6 : vector<128x128xf32> to vector<128x128xbf16>
    %cst_9 = arith.constant dense<0.000000e+00> : vector<128x128xf32>
    %8 = tpu.matmul %7, %2, %cst_9 {dimension_numbers = #tpu.dot_dimension_numbers<[1], [0], [0], [1], [0, 0, 1, 1], [], []>} : vector<128x128xbf16>, vector<128x128xbf16>, vector<128x128xf32> -> vector<128x128xf32>
    %cst_10 = arith.constant dense<0.000000e+00> : vector<128x128xf32>
    %9 = tpu.matmul %1, %3, %cst_10 {dimension_numbers = #tpu.dot_dimension_numbers<[1], [0], [0], [1], [0, 0, 1, 1], [], []>} : vector<128x128xbf16>, vector<128x128xbf16>, vector<128x128xf32> -> vector<128x128xf32>
    %10 = arith.addf %8, %9 : vector<128x128xf32>
    %11 = vector.broadcast %4 : vector<1x128xf32> to vector<128x128xf32>
    %12 = arith.addf %10, %11 : vector<128x128xf32>
    %cst_11 = arith.constant 0.000000e+00 : f32
    %13 = vector.broadcast %cst_11 : f32 to vector<128x128xf32>
    %14 = arith.maximumf %12, %13 : vector<128x128xf32>
    %15 = arith.truncf %14 : vector<128x128xf32> to vector<128x128xbf16>
    %c0_12 = arith.constant 0 : index
    %c0_13 = arith.constant 0 : index
    %16 = vector.load %arg5[%c0_12, %c0_13] : memref<128x128xbf16, #tpu.memory_space<vmem>>, vector<128x128xbf16>
    %c0_14 = arith.constant 0 : index
    %c0_15 = arith.constant 0 : index
    %17 = vector.load %arg6[%c0_14, %c0_15] : memref<128x128xbf16, #tpu.memory_space<vmem>>, vector<128x128xbf16>
    %c0_16 = arith.constant 0 : index
    %c0_17 = arith.constant 0 : index
    %18 = vector.load %arg7[%c0_16, %c0_17] : memref<1x128xf32, #tpu.memory_space<vmem>>, vector<1x128xf32>
    %19 = arith.extf %15 : vector<128x128xbf16> to vector<128x128xf32>
    %cst_18 = arith.constant dense<0.000000e+00> : vector<128x128xf32>
    %20 = tpu.matmul %0, %19, %cst_18 {dimension_numbers = #tpu.dot_dimension_numbers<[1], [0], [0], [1], [0, 0, 1, 1], [], []>} : vector<128x128xf32>, vector<128x128xf32>, vector<128x128xf32> -> vector<128x128xf32>
    %21 = arith.truncf %20 : vector<128x128xf32> to vector<128x128xbf16>
    %cst_19 = arith.constant dense<0.000000e+00> : vector<128x128xf32>
    %22 = tpu.matmul %21, %16, %cst_19 {dimension_numbers = #tpu.dot_dimension_numbers<[1], [0], [0], [1], [0, 0, 1, 1], [], []>} : vector<128x128xbf16>, vector<128x128xbf16>, vector<128x128xf32> -> vector<128x128xf32>
    %cst_20 = arith.constant dense<0.000000e+00> : vector<128x128xf32>
    %23 = tpu.matmul %15, %17, %cst_20 {dimension_numbers = #tpu.dot_dimension_numbers<[1], [0], [0], [1], [0, 0, 1, 1], [], []>} : vector<128x128xbf16>, vector<128x128xbf16>, vector<128x128xf32> -> vector<128x128xf32>
    %24 = arith.addf %22, %23 : vector<128x128xf32>
    %25 = vector.broadcast %18 : vector<1x128xf32> to vector<128x128xf32>
    %26 = arith.addf %24, %25 : vector<128x128xf32>
    %cst_21 = arith.constant 0.000000e+00 : f32
    %27 = vector.broadcast %cst_21 : f32 to vector<128x128xf32>
    %28 = arith.maximumf %26, %27 : vector<128x128xf32>
    %29 = arith.truncf %28 : vector<128x128xf32> to vector<128x128xbf16>
    %c0_22 = arith.constant 0 : index
    %c0_23 = arith.constant 0 : index
    %30 = vector.load %arg8[%c0_22, %c0_23] : memref<128x128xbf16, #tpu.memory_space<vmem>>, vector<128x128xbf16>
    %c0_24 = arith.constant 0 : index
    %c0_25 = arith.constant 0 : index
    %31 = vector.load %arg9[%c0_24, %c0_25] : memref<128x128xbf16, #tpu.memory_space<vmem>>, vector<128x128xbf16>
    %c0_26 = arith.constant 0 : index
    %c0_27 = arith.constant 0 : index
    %32 = vector.load %arg10[%c0_26, %c0_27] : memref<1x128xf32, #tpu.memory_space<vmem>>, vector<1x128xf32>
    %33 = arith.extf %29 : vector<128x128xbf16> to vector<128x128xf32>
    %cst_28 = arith.constant dense<0.000000e+00> : vector<128x128xf32>
    %34 = tpu.matmul %0, %33, %cst_28 {dimension_numbers = #tpu.dot_dimension_numbers<[1], [0], [0], [1], [0, 0, 1, 1], [], []>} : vector<128x128xf32>, vector<128x128xf32>, vector<128x128xf32> -> vector<128x128xf32>
    %35 = arith.truncf %34 : vector<128x128xf32> to vector<128x128xbf16>
    %cst_29 = arith.constant dense<0.000000e+00> : vector<128x128xf32>
    %36 = tpu.matmul %35, %30, %cst_29 {dimension_numbers = #tpu.dot_dimension_numbers<[1], [0], [0], [1], [0, 0, 1, 1], [], []>} : vector<128x128xbf16>, vector<128x128xbf16>, vector<128x128xf32> -> vector<128x128xf32>
    %cst_30 = arith.constant dense<0.000000e+00> : vector<128x128xf32>
    %37 = tpu.matmul %29, %31, %cst_30 {dimension_numbers = #tpu.dot_dimension_numbers<[1], [0], [0], [1], [0, 0, 1, 1], [], []>} : vector<128x128xbf16>, vector<128x128xbf16>, vector<128x128xf32> -> vector<128x128xf32>
    %38 = arith.addf %36, %37 : vector<128x128xf32>
    %39 = vector.broadcast %32 : vector<1x128xf32> to vector<128x128xf32>
    %40 = arith.addf %38, %39 : vector<128x128xf32>
    %41 = tpu.iota {dimensions = array<i32: 1>} : vector<128x128xi32>
    %c8_i32 = arith.constant 8 : i32
    %42 = vector.broadcast %c8_i32 : i32 to vector<128x128xi32>
    %43 = arith.cmpi slt, %41, %42 : vector<128x128xi32>
    %cst_31 = arith.constant -1.000000e+30 : f32
    %44 = vector.broadcast %cst_31 : f32 to vector<128x128xf32>
    %45 = arith.select %43, %40, %44 : vector<128x128xi1>, vector<128x128xf32>
    %cst_32 = arith.constant dense<0xFF800000> : vector<128xf32>
    %46 = vector.multi_reduction <maximumf>, %45, %cst_32 [1] : vector<128x128xf32> to vector<128xf32>
    %47 = vector.shape_cast %46 : vector<128xf32> to vector<128x1xf32>
    %48 = vector.broadcast %47 : vector<128x1xf32> to vector<128x128xf32>
    %49 = arith.subf %45, %48 : vector<128x128xf32>
    %50 = math.exp %49 : vector<128x128xf32>
    %cst_33 = arith.constant dense<0.000000e+00> : vector<128xf32>
    %51 = vector.multi_reduction <add>, %50, %cst_33 [1] : vector<128x128xf32> to vector<128xf32>
    %52 = vector.shape_cast %51 : vector<128xf32> to vector<128x1xf32>
    %53 = math.log %52 : vector<128x1xf32>
    %54 = vector.broadcast %53 : vector<128x1xf32> to vector<128x128xf32>
    %55 = arith.subf %49, %54 : vector<128x128xf32>
    %c0_34 = arith.constant 0 : index
    %c0_35 = arith.constant 0 : index
    %56 = vector.load %arg11[%c0_34, %c0_35] : memref<128x128xf32, #tpu.memory_space<vmem>>, vector<128x128xf32>
    tpu.vector_store %arg11[%c0_34, %c0_35], %55 {strides = array<i32>} : memref<128x128xf32, #tpu.memory_space<vmem>>, vector<128x128xf32>,
    return
  }
}

</mosaic_0001>

<bundles_post_ra>
// kernel: sage_forward.1
= control target key start
LH: loop header
LB: loop body
LE: loop exit
PB: predicated region body
PF: predicated region fallthrough
CT: control target
= control target key end

     0   :  { %16 = vsyncpa [#allocation3], 0  ;;  %s3681_s0 = inlined_call_operand.vmem [shape: f32[128,128], index: 0, kind: input, shape index: {}]   ;;  %s3682_s1 = inlined_call_operand.vmem [shape: bf16[128,128], index: 1, kind: input, shape index: {}]   ;;  %s3683_s2 = inlined_call_operand.hbm [shape: bf16[128,128], index: 2, kind: input, shape index: {}]   ;;  %s3684_s3 = inlined_call_operand.hbm [shape: bf16[128,128], index: 3, kind: input, shape index: {}]   ;;  %s3685_s4 = inlined_call_operand.vmem [shape: f32[1,128], index: 4, kind: input, shape index: {}]   ;;  %s3686_s5 = inlined_call_operand.hbm [shape: bf16[128,128], index: 5, kind: input, shape index: {}]   ;;  %s3687_s6 = inlined_call_operand.hbm [shape: bf16[128,128], index: 6, kind: input, shape index: {}]   ;;  %s3688_s7 = inlined_call_operand.vmem [shape: f32[1,128], index: 7, kind: input, shape index: {}]   ;;  %s3689_s8 = inlined_call_operand.hbm [shape: bf16[128,128], index: 8, kind: input, shape index: {}]   ;;  %s3690_s9 = inlined_call_operand.vmem [shape: bf16[128,128], index: 9, kind: input, shape index: {}]   ;;  %s3691_s10 = inlined_call_operand.vmem [shape: f32[1,128], index: 10, kind: input, shape index: {}]   ;;  %s3692_s11 = inlined_call_operand.vmem [shape: f32[128,128], index: 11, kind: output, shape index: {}]  }
   0x1   :  { %17 = vsyncpa [#allocation5], 0 }
   0x2   :  { %18 = vsyncpa [#allocation8], 0  ;;  %s3009_s17 = smov [#allocation4]   ;;  %s3010_s19 = smov [#allocation7]  }
   0x3   :  { %s40_s18 = sshll.u32 %s3009_s17, 4  ;;  %s66_s20 = sshll.u32 %s3010_s19, 4  ;;  %s41_s18 = int_to_ptr.vmem [resolvable:$true] %s40_s18  ;;  %s3076_s20 = int_to_ptr.vmem [resolvable:$true] %s66_s20 }
   0x4   :  { %s2893_s23 = scalar_lea.hbm %s3684_s3, 1024 }
   0x5   :  { %p2894_p0 = scmp.ne.s32.totalorder %s3684_s3, %s2893_s23  ;;  %p2897_p1 = scmp.lt.u32.totalorder %s2893_s23, %s3684_s3 }
   0x7   :  { %p2899_p2 = pnand %p2897_p1, %p2894_p0 }
   0x9   :  { %2902 = shalt.err (!%p2899_p2)
}
   0xa   :  { %s2903_s28 = scalar_lea.vmem %s41_s18, 1024  ;;  %p2908_p4 = scmp.lt.s32.totalorder %s41_s18, %s41_s18 }
   0xb   :  { %p2904_p3 = scmp.ne.s32.totalorder %s41_s18, %s2903_s28  ;;  %p2909_p5 = scmp.lt.s32.totalorder %s2903_s28, %s2903_s28 }
   0xd   :  { %p2910_p6 = por %p2909_p5, %p2908_p4 }
   0xf   :  { %p2911_p7 = pnand %p2910_p6, %p2904_p3 }
  0x11   :  { %2914 = shalt.err (!%p2911_p7)
}
  0x12   :  { %s3011_s29 = smov 64   ;;  %s3012_s30 = smov 4  }
  0x13   :  { %46 = dma.hbm_to_vmem [thread:$0]  %s3684_s3, 1024, %s41_s18, [#allocation5], %s3011_s29, %s3011_s29, %s3012_s30  }
  0x14   :  { %s2915_s16 = scalar_lea.hbm %s3687_s6, 1024 }
  0x15   :  { %p2916_p8 = scmp.ne.s32.totalorder %s3687_s6, %s2915_s16  ;;  %p2919_p9 = scmp.lt.u32.totalorder %s2915_s16, %s3687_s6 }
  0x17   :  { %p2921_p10 = pnand %p2919_p9, %p2916_p8 }
  0x19   :  { %2924 = shalt.err (!%p2921_p10)
}
  0x1a   :  { %s2925_s23 = scalar_lea.vmem %s3076_s20, 1024  ;;  %p2930_p12 = scmp.lt.s32.totalorder %s3076_s20, %s3076_s20 }
  0x1b   :  { %p2926_p11 = scmp.ne.s32.totalorder %s3076_s20, %s2925_s23  ;;  %p2931_p13 = scmp.lt.s32.totalorder %s2925_s23, %s2925_s23 }
  0x1d   :  { %p2932_p0 = por %p2931_p13, %p2930_p12 }
  0x1f   :  { %p2933_p1 = pnand %p2932_p0, %p2926_p11 }
  0x21   :  { %2936 = shalt.err (!%p2933_p1)
}
  0x22   :  { %72 = dma.hbm_to_vmem [thread:$0]  %s3687_s6, 1024, %s3076_s20, [#allocation8], %s3011_s29, %s3011_s29, %s3012_s30  }
  0x23   :  { %s3013_s24 = smov [#allocation2]   ;;  %s3014_s26 = smov [#allocation6]  }
  0x24   :  { %s28_s25 = sshll.u32 %s3013_s24, 4  ;;  %s54_s27 = sshll.u32 %s3014_s26, 4  ;;  %s29_s25 = int_to_ptr.vmem [resolvable:$true] %s28_s25  ;;  %s3113_s27 = int_to_ptr.vmem [resolvable:$true] %s54_s27 }
  0x25   :  { %s2937_s13 = scalar_lea.hbm %s3683_s2, 1024 }
  0x26   :  { %p2938_p2 = scmp.ne.s32.totalorder %s3683_s2, %s2937_s13  ;;  %p2941_p3 = scmp.lt.u32.totalorder %s2937_s13, %s3683_s2 }
  0x28   :  { %p2943_p4 = pnand %p2941_p3, %p2938_p2 }
  0x2a   :  { %2946 = shalt.err (!%p2943_p4)
}
  0x2b   :  { %s2947_s6 = scalar_lea.vmem %s29_s25, 1024  ;;  %p2952_p6 = scmp.lt.s32.totalorder %s29_s25, %s29_s25 }
  0x2c   :  { %p2948_p5 = scmp.ne.s32.totalorder %s29_s25, %s2947_s6  ;;  %p2953_p7 = scmp.lt.s32.totalorder %s2947_s6, %s2947_s6 }
  0x2e   :  { %p2954_p8 = por %p2953_p7, %p2952_p6 }
  0x30   :  { %p2955_p9 = pnand %p2954_p8, %p2948_p5 }
  0x32   :  { %2958 = shalt.err (!%p2955_p9)
}
  0x33   :  { %34 = dma.hbm_to_vmem [thread:$0]  %s3683_s2, 1024, %s29_s25, [#allocation3], %s3011_s29, %s3011_s29, %s3012_s30  }
  0x34   :  { %s2959_s23 = scalar_lea.hbm %s3686_s5, 1024 }
  0x35   :  { %p2960_p10 = scmp.ne.s32.totalorder %s3686_s5, %s2959_s23  ;;  %p2963_p11 = scmp.lt.u32.totalorder %s2959_s23, %s3686_s5 }
  0x37   :  { %p2965_p12 = pnand %p2963_p11, %p2960_p10 }
  0x39   :  { %2968 = shalt.err (!%p2965_p12)
}
  0x3a   :  { %s2969_s28 = scalar_lea.vmem %s3113_s27, 1024  ;;  %p2974_p0 = scmp.lt.s32.totalorder %s3113_s27, %s3113_s27 }
  0x3b   :  { %p2970_p13 = scmp.ne.s32.totalorder %s3113_s27, %s2969_s28  ;;  %p2975_p1 = scmp.lt.s32.totalorder %s2969_s28, %s2969_s28 }
  0x3d   :  { %p2976_p2 = por %p2975_p1, %p2974_p0 }
  0x3f   :  { %p2977_p3 = pnand %p2976_p2, %p2970_p13 }
  0x41   :  { %2980 = shalt.err (!%p2977_p3)
}
  0x42   :  { %60 = dma.hbm_to_vmem [thread:$0]  %s3686_s5, 1024, %s3113_s27, [#allocation5], %s3011_s29, %s3011_s29, %s3012_s30  }
  0x43   :  { %s3015_s12 = smov [#allocation9]   ;;  %s2981_s16 = scalar_lea.hbm %s3689_s8, 1024 }
  0x44   :  { %s80_s13 = sshll.u32 %s3015_s12, 4  ;;  %p2982_p4 = scmp.ne.s32.totalorder %s3689_s8, %s2981_s16  ;;  %s81_s13 = int_to_ptr.vmem [resolvable:$true] %s80_s13 }
  0x45   :  { %p2985_p5 = scmp.lt.u32.totalorder %s2981_s16, %s3689_s8 }
  0x47   :  { %p2987_p6 = pnand %p2985_p5, %p2982_p4 }
  0x49   :  { %2990 = shalt.err (!%p2987_p6)
}
  0x4a   :  { %s2991_s21 = scalar_lea.vmem %s81_s13, 1024  ;;  %p2996_p8 = scmp.lt.s32.totalorder %s81_s13, %s81_s13 }
  0x4b   :  { %p2992_p7 = scmp.ne.s32.totalorder %s81_s13, %s2991_s21  ;;  %p2997_p9 = scmp.lt.s32.totalorder %s2991_s21, %s2991_s21 }
  0x4d   :  { %p2998_p10 = por %p2997_p9, %p2996_p8 }
  0x4f   :  { %p2999_p11 = pnand %p2998_p10, %p2992_p7 }
  0x51   :  { %3002 = shalt.err (!%p2999_p11)
}
  0x52   :  { %86 = dma.hbm_to_vmem [thread:$0]  %s3689_s8, 1024, %s81_s13, [#allocation8], %s3011_s29, %s3011_s29, %s3012_s30  }
  0x53   :  { %3003 = dma.done.wait [#allocation3], 1024  }
  0x54   :  { %3004 = vsyncadd [#allocation3], 4294966272 }
  0x55   :  { %3005 = dma.done.wait [#allocation5], 2048  }
  0x56   :  { %3006 = vsyncadd [#allocation5], 4294965248 }
  0x57   :  { %3007 = dma.done.wait [#allocation8], 2048  }
  0x58   :  { %3008 = vsyncadd [#allocation8], 4294965248  ;;  %v2773_v0 = vld [vmem:[%s3682_s1] sm:$0xff]   ;;  %v3171_v1 = vld [vmem:[%s3682_s1 + $0x8] sm:$0xff]  }
  0x59   :  { %2591 = vmatprep.subr.bf16.mxu0 %v2773_v0  ;;  %2302 = vmatprep.mubr.bf16.mxu1 %v2773_v0  ;;  %v3177_v2 = vld [vmem:[%s3682_s1 + $0x10] sm:$0xff]   ;;  %v3184_v3 = vld [vmem:[%s3682_s1 + $0x18] sm:$0xff]   ;;  %v3189_v4 = vld [vmem:[%s3681_s0] sm:$0xff] }
  0x5a   :  { %2593 = vmatpush3.bf16.msra.mxu0 %v2773_v0  ;;  %2262 = vmatprep.mubr.f32.mxu0 %v3189_v4  ;;  %v3197_v5 = vld [vmem:[%s3682_s1 + $0x20] sm:$0xff]   ;;  %v2782_v7 = vld [vmem:[#allocation4 + $0x8] sm:$0xff]   ;;  %v2783_v9 = vld [vmem:[#allocation4 + $0x10] sm:$0xff]  }
  0x5b   :  { %2595 = vmatprep.subr.bf16.mxu0 %v3171_v1  ;;  %v2781_v6 = vld [vmem:[#allocation4] sm:$0xff]   ;;  %v3204_v8 = vld [vmem:[%s3682_s1 + $0x28] sm:$0xff]   ;;  %v3211_v10 = vld [vmem:[%s3682_s1 + $0x30] sm:$0xff]  }
  0x5c   :  { %2286 = vmatprep.subr.bf16.mxu1 %v2781_v6  ;;  %v2784_v11 = vld [vmem:[#allocation4 + $0x18] sm:$0xff]   ;;  %v2785_v13 = vld [vmem:[#allocation4 + $0x20] sm:$0xff]   ;;  %v2786_v14 = vld [vmem:[#allocation4 + $0x28] sm:$0xff]  }
  0x5d   :  { %2287 = vmatpush3.bf16.msra.mxu1 %v2781_v6  ;;  %v3218_v12 = vld [vmem:[%s3682_s1 + $0x38] sm:$0xff]   ;;  %v3225_v15 = vld [vmem:[%s3681_s0 + $0x8] sm:$0xff]  ;;  %v3230_v16 = vld [vmem:[%s3681_s0 + $0x10] sm:$0xff] }
  0x5e   :  { %2597 = vmatpush3.bf16.msra.mxu0 %v3171_v1  ;;  %2288 = vmatprep.subr.bf16.mxu1 %v2782_v7  ;;  %v2787_v17 = vld [vmem:[#allocation4 + $0x30] sm:$0xff]   ;;  %v3236_v18 = vld [vmem:[%s3681_s0 + $0x18] sm:$0xff]  ;;  %v3242_v19 = vld [vmem:[%s3681_s0 + $0x20] sm:$0xff] }
  0x5f   :  { %2599 = vmatprep.subr.bf16.mxu0 %v3177_v2  ;;  %v2788_v20 = vld [vmem:[#allocation4 + $0x38] sm:$0xff]   ;;  %v3248_v21 = vld [vmem:[%s3681_s0 + $0x28] sm:$0xff]  ;;  %v3254_v22 = vld [vmem:[%s3681_s0 + $0x30] sm:$0xff] }
  0x60   :  { %v2789_v23 = vld [vmem:[#allocation2] sm:$0xff]   ;;  %v3260_v24 = vld [vmem:[%s3681_s0 + $0x38] sm:$0xff]  ;;  %v2790_v26 = vld [vmem:[#allocation2 + $0x8] sm:$0xff]  }
  0x61   :  { %2289 = vmatpush3.bf16.msra.mxu1 %v2782_v7  ;;  %v3266_v25 = vld [vmem:[%s3681_s0 + $0x40] sm:$0xff]  ;;  %v3272_v27 = vld [vmem:[%s3681_s0 + $0x48] sm:$0xff]  ;;  %v3278_v28 = vld [vmem:[%s3681_s0 + $0x50] sm:$0xff] }
  0x62   :  { %2601 = vmatpush3.bf16.msra.mxu0 %v3177_v2  ;;  %2290 = vmatprep.subr.bf16.mxu1 %v2783_v9  ;;  %v2791_v29 = vld [vmem:[#allocation2 + $0x10] sm:$0xff]   ;;  %v3288_v30 = vld [vmem:[%s3681_s0 + $0x58] sm:$0xff]  ;;  %v3293_v31 = vld [vmem:[%s3681_s0 + $0x60] sm:$0xff] }
  0x63   :  { %2603 = vmatprep.subr.bf16.mxu0 %v3184_v3  ;;  %v2792_v32 = vld [vmem:[#allocation2 + $0x18] sm:$0xff]   ;;  %v3300_v33 = vld [vmem:[%s3681_s0 + $0x68] sm:$0xff]  ;;  %v3305_v34 = vld [vmem:[%s3681_s0 + $0x70] sm:$0xff] }
  0x64   :  { %v2793_v35 = vld [vmem:[#allocation2 + $0x20] sm:$0xff]   ;;  %v3314_v36 = vld [vmem:[%s3681_s0 + $0x78] sm:$0xff]  ;;  %v2794_v37 = vld [vmem:[#allocation2 + $0x28] sm:$0xff]  }
  0x65   :  { %2291 = vmatpush3.bf16.msra.mxu1 %v2783_v9  ;;  %v2795_v38 = vld [vmem:[#allocation2 + $0x30] sm:$0xff]   ;;  %v2796_v39 = vld [vmem:[#allocation2 + $0x38] sm:$0xff]   ;;  %v2003_v0 = vld [vmem:[%s3685_s4] ss:$0 sm:$0xff] }
  0x66   :  { %2605 = vmatpush3.bf16.msra.mxu0 %v3184_v3  ;;  %2292 = vmatprep.subr.bf16.mxu1 %v2784_v11 }
  0x67   :  { %2607 = vmatprep.subr.bf16.mxu0 %v3197_v5 }
  0x69   :  { %2293 = vmatpush3.bf16.msra.mxu1 %v2784_v11 }
  0x6a   :  { %2609 = vmatpush3.bf16.msra.mxu0 %v3197_v5  ;;  %2294 = vmatprep.subr.bf16.mxu1 %v2785_v13 }
  0x6b   :  { %2611 = vmatprep.subr.bf16.mxu0 %v3204_v8 }
  0x6d   :  { %2295 = vmatpush3.bf16.msra.mxu1 %v2785_v13 }
  0x6e   :  { %2613 = vmatpush3.bf16.msra.mxu0 %v3204_v8  ;;  %2296 = vmatprep.subr.bf16.mxu1 %v2786_v14 }
  0x6f   :  { %2615 = vmatprep.subr.bf16.mxu0 %v3211_v10 }
  0x71   :  { %2297 = vmatpush3.bf16.msra.mxu1 %v2786_v14 }
  0x72   :  { %2617 = vmatpush3.bf16.msra.mxu0 %v3211_v10  ;;  %2298 = vmatprep.subr.bf16.mxu1 %v2787_v17 }
  0x73   :  { %2619 = vmatprep.subr.bf16.mxu0 %v3218_v12 }
  0x75   :  { %2299 = vmatpush3.bf16.msra.mxu1 %v2787_v17 }
  0x76   :  { %2621 = vmatpush3.bf16.msra.mxu0 %v3218_v12  ;;  %2300 = vmatprep.subr.bf16.mxu1 %v2788_v20 }
  0x79   :  { %2263 = vmatmul.mubr.f32.vlgmr.msra.gmra.mrb[0].mxu0 %v3225_v15  ;;  %2301 = vmatpush3.bf16.msra.mxu1 %v2788_v20 }
  0x7a   :  { %2265 = vmatprep.mubr.f32.mxu0 %v3230_v16  ;;  %2318 = vmatprep.subr.bf16.mxu1 %v2789_v23 }
  0x7c   :  { %2303 = vmatmul.mubr.bf16.vlgmr.msra.gmra.mrb[0].mxu1 %v3171_v1 }
  0x7d   :  { %2266 = vmatmul.mubr.f32.gmra.mrb[2].mxu0 %v3236_v18  ;;  %2319 = vmatpush3.bf16.msra.mxu1 %v2789_v23 }
  0x7e   :  { %2268 = vmatprep.mubr.f32.mxu0 %v3242_v19  ;;  %2306 = vmatprep.mubr.bf16.mxu1 %v3177_v2 }
  0x7f   :  { %2320 = vmatprep.subr.bf16.mxu1 %v2790_v26 }
  0x81   :  { %2269 = vmatmul.mubr.f32.gmra.mrb[4].mxu0 %v3248_v21  ;;  %2321 = vmatpush3.bf16.msra.mxu1 %v2790_v26 }
  0x82   :  { %2271 = vmatprep.mubr.f32.mxu0 %v3254_v22  ;;  %2322 = vmatprep.subr.bf16.mxu1 %v2791_v29 }
  0x84   :  { %2307 = vmatmul.mubr.bf16.gmra.mrb[4].mxu1 %v3184_v3 }
  0x85   :  { %2272 = vmatmul.mubr.f32.gmra.mrb[6].mxu0 %v3260_v24  ;;  %2323 = vmatpush3.bf16.msra.mxu1 %v2791_v29 }
  0x86   :  { %2274 = vmatprep.mubr.f32.mxu0 %v3266_v25  ;;  %2310 = vmatprep.mubr.bf16.mxu1 %v3197_v5 }
  0x87   :  { %2324 = vmatprep.subr.bf16.mxu1 %v2792_v32 }
  0x89   :  { %2275 = vmatmul.mubr.f32.gmra.mrb[8].mxu0 %v3272_v27  ;;  %2325 = vmatpush3.bf16.msra.mxu1 %v2792_v32 }
  0x8a   :  { %2277 = vmatprep.mubr.f32.mxu0 %v3278_v28  ;;  %2326 = vmatprep.subr.bf16.mxu1 %v2793_v35 }
  0x8c   :  { %2311 = vmatmul.mubr.bf16.gmra.mrb[8].mxu1 %v3204_v8 }
  0x8d   :  { %2278 = vmatmul.mubr.f32.gmra.mrb[10].mxu0 %v3288_v30  ;;  %2327 = vmatpush3.bf16.msra.mxu1 %v2793_v35 }
  0x8e   :  { %2280 = vmatprep.mubr.f32.mxu0 %v3293_v31  ;;  %2314 = vmatprep.mubr.bf16.mxu1 %v3211_v10 }
  0x8f   :  { %2328 = vmatprep.subr.bf16.mxu1 %v2794_v37 }
  0x91   :  { %2281 = vmatmul.mubr.f32.gmra.mrb[12].mxu0 %v3300_v33  ;;  %2329 = vmatpush3.bf16.msra.mxu1 %v2794_v37 }
  0x92   :  { %2283 = vmatprep.mubr.f32.mxu0 %v3305_v34  ;;  %2330 = vmatprep.subr.bf16.mxu1 %v2795_v38 }
  0x94   :  { %2315 = vmatmul.mubr.bf16.gmra.mrb[12].mxu1 %v3218_v12 }
  0x95   :  { %2284 = vmatmul.mubr.f32.gmra.mrb[14].mxu0 %v3314_v36  ;;  %2331 = vmatpush3.bf16.msra.mxu1 %v2795_v38 }
  0x96   :  { %2382 = vmatprep.mubr.f32.mxu0 %v3189_v4  ;;  %2332 = vmatprep.subr.bf16.mxu1 %v2796_v39 }
  0x99   :  { %2333 = vmatpush3.bf16.msra.mxu1 %v2796_v39 }
 0x14c   :  { %v2264_v40 = vpop.f32.mrb[0].mxu0 }
 0x14d   :  { %v254_v41 = vpop.f32.mrb[1].mxu0 }
 0x14e   :  { %v333_v42 = vpack.c.bf16 %v2264_v40, %v254_v41 }
 0x150   :  { %v2267_v43 = vpop.f32.mrb[2].mxu0  ;;  %2334 = vmatprep.mubr.bf16.mxu1 %v333_v42 }
 0x151   :  { %v264_v44 = vpop.f32.mrb[3].mxu0 }
 0x152   :  { %v334_v45 = vpack.c.bf16 %v2267_v43, %v264_v44 }
 0x154   :  { %v2270_v46 = vpop.f32.mrb[4].mxu0  ;;  %2335 = vmatmul.mubr.bf16.vlgmr.msra.gmra.mrb[0].mxu1 %v334_v45 }
 0x155   :  { %v274_v47 = vpop.f32.mrb[5].mxu0 }
 0x156   :  { %v335_v48 = vpack.c.bf16 %v2270_v46, %v274_v47 }
 0x158   :  { %v2273_v49 = vpop.f32.mrb[6].mxu0  ;;  %2338 = vmatprep.mubr.bf16.mxu1 %v335_v48 }
 0x159   :  { %v284_v50 = vpop.f32.mrb[7].mxu0 }
 0x15a   :  { %v336_v51 = vpack.c.bf16 %v2273_v49, %v284_v50 }
 0x15c   :  { %v2276_v52 = vpop.f32.mrb[8].mxu0  ;;  %2339 = vmatmul.mubr.bf16.gmra.mrb[4].mxu1 %v336_v51 }
 0x15d   :  { %v294_v53 = vpop.f32.mrb[9].mxu0 }
 0x15e   :  { %v337_v54 = vpack.c.bf16 %v2276_v52, %v294_v53 }
 0x160   :  { %v2279_v55 = vpop.f32.mrb[10].mxu0  ;;  %2342 = vmatprep.mubr.bf16.mxu1 %v337_v54 }
 0x161   :  { %v304_v56 = vpop.f32.mrb[11].mxu0 }
 0x162   :  { %v338_v57 = vpack.c.bf16 %v2279_v55, %v304_v56 }
 0x164   :  { %v2282_v58 = vpop.f32.mrb[12].mxu0  ;;  %2343 = vmatmul.mubr.bf16.gmra.mrb[8].mxu1 %v338_v57 }
 0x165   :  { %v314_v59 = vpop.f32.mrb[13].mxu0 }
 0x166   :  { %v339_v60 = vpack.c.bf16 %v2282_v58, %v314_v59 }
 0x168   :  { %v2285_v61 = vpop.f32.mrb[14].mxu0  ;;  %2346 = vmatprep.mubr.bf16.mxu1 %v339_v60 }
 0x169   :  { %v324_v62 = vpop.f32.mrb[15].mxu0 }
 0x16a   :  { %v340_v63 = vpack.c.bf16 %v2285_v61, %v324_v62 }
 0x16c   :  { %2347 = vmatmul.mubr.bf16.gmra.mrb[12].mxu1 %v340_v63 }
 0x16d   :  { %2502 = vmatprep.mubr.f32.mxu1 %v3189_v4 }
 0x227   :  { %v2336_v1 = vpop.f32.mrb[0].mxu1 }
 0x228   :  { %v687_v2 = vadd.f32 %v2336_v1, %v2003_v0  ;;  %v616_v3 = vpop.f32.mrb[1].mxu1 }
 0x229   :  { %v685_v5 = vadd.f32 %v2003_v0, %v616_v3  ;;  %v2337_v6 = vpop.f32.mrb[2].mxu1 }
 0x22a   :  { %v688_v7 = vadd.f32 %v2337_v6, %v2003_v0  ;;  %v619_v8 = vpop.f32.mrb[3].mxu1  ;;  %v703_v10 = vmax.f32 %v687_v2, 0.0 }
 0x22b   :  { %v686_v9 = vadd.f32 %v2003_v0, %v619_v8  ;;  %v701_v12 = vmax.f32 %v685_v5, 0.0 }
 0x22c   :  { %v704_v11 = vmax.f32 %v688_v7, 0.0 }
 0x22d   :  { %v702_v13 = vmax.f32 %v686_v9, 0.0 }
 0x22e   :  { %v3325_v14 = vpack.c.bf16 %v704_v11, %v703_v10  ;;  %v2797_v10 = vld [vmem:[#allocation7] sm:$0xff]   ;;  %v2799_v11 = vld [vmem:[#allocation7 + $0x10] sm:$0xff]  }
 0x22f   :  { %v3327_v17 = vpack.c.bf16 %v702_v13, %v701_v12  ;;  %v2340_v4 = vpop.f32.mrb[4].mxu1  ;;  %v2800_v12 = vld [vmem:[#allocation7 + $0x18] sm:$0xff]   ;;  %v2801_v13 = vld [vmem:[#allocation7 + $0x20] sm:$0xff]  }
 0x230   :  { %v691_v20 = vadd.f32 %v2340_v4, %v2003_v0  ;;  %v632_v23 = vpop.f32.mrb[5].mxu1  ;;  %v2802_v4 = vld [vmem:[#allocation7 + $0x28] sm:$0xff]  }
 0x231   :  { %v689_v26 = vadd.f32 %v2003_v0, %v632_v23  ;;  %v2341_v29 = vpop.f32.mrb[6].mxu1  ;;  %2623 = vmatprep.subr.bf16.mxu0 %v3327_v17  ;;  %v2804_v23 = vld [vmem:[#allocation7 + $0x38] sm:$0xff]  }
 0x232   :  { %v692_v32 = vadd.f32 %v2341_v29, %v2003_v0  ;;  %v635_v35 = vpop.f32.mrb[7].mxu1  ;;  %2625 = vmatpush3.bf16.msra.mxu0 %v3327_v17  ;;  %v707_v38 = vmax.f32 %v691_v20, 0.0  ;;  %v2803_v20 = vld [vmem:[#allocation7 + $0x30] sm:$0xff]   ;;  %v2806_v29 = vld [vmem:[#allocation6 + $0x8] sm:$0xff]  }
 0x233   :  { %v690_v37 = vadd.f32 %v2003_v0, %v635_v35  ;;  %2627 = vmatprep.subr.bf16.mxu0 %v3325_v14  ;;  %v705_v40 = vmax.f32 %v689_v26, 0.0  ;;  %v2805_v26 = vld [vmem:[#allocation6] sm:$0xff]   ;;  %v2808_v35 = vld [vmem:[#allocation6 + $0x18] sm:$0xff]  }
 0x234   :  { %v708_v39 = vmax.f32 %v692_v32, 0.0  ;;  %v2807_v32 = vld [vmem:[#allocation6 + $0x10] sm:$0xff]  }
 0x235   :  { %v706_v41 = vmax.f32 %v690_v37, 0.0  ;;  %v2809_v37 = vld [vmem:[#allocation6 + $0x20] sm:$0xff]  }
 0x236   :  { %v3332_v42 = vpack.c.bf16 %v708_v39, %v707_v38  ;;  %2629 = vmatpush3.bf16.msra.mxu0 %v3325_v14  ;;  %v2812_v38 = vld [vmem:[#allocation6 + $0x38] sm:$0xff]  }
 0x237   :  { %v3335_v43 = vpack.c.bf16 %v706_v41, %v705_v40  ;;  %v2344_v44 = vpop.f32.mrb[8].mxu1 }
 0x238   :  { %v695_v45 = vadd.f32 %v2344_v44, %v2003_v0  ;;  %v648_v46 = vpop.f32.mrb[9].mxu1 }
 0x239   :  { %v693_v47 = vadd.f32 %v2003_v0, %v648_v46  ;;  %v2345_v48 = vpop.f32.mrb[10].mxu1  ;;  %2631 = vmatprep.subr.bf16.mxu0 %v3335_v43 }
 0x23a   :  { %v696_v49 = vadd.f32 %v2345_v48, %v2003_v0  ;;  %v651_v50 = vpop.f32.mrb[11].mxu1  ;;  %2633 = vmatpush3.bf16.msra.mxu0 %v3335_v43  ;;  %v711_v52 = vmax.f32 %v695_v45, 0.0 }
 0x23b   :  { %v694_v51 = vadd.f32 %v2003_v0, %v651_v50  ;;  %2635 = vmatprep.subr.bf16.mxu0 %v3332_v42  ;;  %v709_v54 = vmax.f32 %v693_v47, 0.0 }
 0x23c   :  { %v712_v53 = vmax.f32 %v696_v49, 0.0 }
 0x23d   :  { %v710_v55 = vmax.f32 %v694_v51, 0.0 }
 0x23e   :  { %v3340_v56 = vpack.c.bf16 %v712_v53, %v711_v52  ;;  %2637 = vmatpush3.bf16.msra.mxu0 %v3332_v42 }
 0x23f   :  { %v3343_v57 = vpack.c.bf16 %v710_v55, %v709_v54  ;;  %v2348_v58 = vpop.f32.mrb[12].mxu1 }
 0x240   :  { %v699_v59 = vadd.f32 %v2348_v58, %v2003_v0  ;;  %v664_v60 = vpop.f32.mrb[13].mxu1 }
 0x241   :  { %v697_v61 = vadd.f32 %v2003_v0, %v664_v60  ;;  %v2349_v62 = vpop.f32.mrb[14].mxu1  ;;  %2639 = vmatprep.subr.bf16.mxu0 %v3343_v57 }
 0x242   :  { %v700_v63 = vadd.f32 %v2349_v62, %v2003_v0  ;;  %v667_v1 = vpop.f32.mrb[15].mxu1  ;;  %2641 = vmatpush3.bf16.msra.mxu0 %v3343_v57  ;;  %v715_v3 = vmax.f32 %v699_v59, 0.0 }
 0x243   :  { %v698_v2 = vadd.f32 %v2003_v0, %v667_v1  ;;  %2643 = vmatprep.subr.bf16.mxu0 %v3340_v56  ;;  %v713_v6 = vmax.f32 %v697_v61, 0.0  ;;  %v2798_v0 = vld [vmem:[#allocation7 + $0x8] sm:$0xff]  }
 0x244   :  { %v716_v5 = vmax.f32 %v700_v63, 0.0  ;;  %v3380_v63 = vld [vmem:[#allocation9] sm:$0xff]   ;;  %v3382_v1 = vld [vmem:[#allocation9 + $0x8] sm:$0xff]  }
 0x245   :  { %v714_v7 = vmax.f32 %v698_v2, 0.0  ;;  %v3387_v2 = vld [vmem:[#allocation9 + $0x10] sm:$0xff]  }
 0x246   :  { %v3348_v8 = vpack.c.bf16 %v716_v5, %v715_v3  ;;  %2645 = vmatpush3.bf16.msra.mxu0 %v3340_v56  ;;  %v3391_v3 = vld [vmem:[#allocation9 + $0x18] sm:$0xff]   ;;  %v3395_v5 = vld [vmem:[#allocation9 + $0x20] sm:$0xff]  }
 0x247   :  { %v3351_v9 = vpack.c.bf16 %v714_v7, %v713_v6  ;;  %v3399_v6 = vld [vmem:[#allocation9 + $0x28] sm:$0xff]   ;;  %v2020_v7 = vld [vmem:[%s3688_s7] ss:$0 sm:$0xff] }
 0x249   :  { %2647 = vmatprep.subr.bf16.mxu0 %v3351_v9 }
 0x24a   :  { %2649 = vmatpush3.bf16.msra.mxu0 %v3351_v9 }
 0x24b   :  { %2651 = vmatprep.subr.bf16.mxu0 %v3348_v8 }
 0x24e   :  { %2653 = vmatpush3.bf16.msra.mxu0 %v3348_v8 }
 0x24f   :  { %2406 = vmatprep.subr.bf16.mxu0 %v2797_v10 }
 0x251   :  { %2383 = vmatmul.mubr.f32.vlgmr.msra.gmra.mrb[16].mxu0 %v3225_v15 }
 0x252   :  { %2407 = vmatpush3.bf16.msra.mxu0 %v2797_v10  ;;  %2385 = vmatprep.mubr.f32.mxu0 %v3230_v16 }
 0x253   :  { %2408 = vmatprep.subr.bf16.mxu0 %v2798_v0 }
 0x255   :  { %2386 = vmatmul.mubr.f32.gmra.mrb[18].mxu0 %v3236_v18 }
 0x256   :  { %2409 = vmatpush3.bf16.msra.mxu0 %v2798_v0  ;;  %2388 = vmatprep.mubr.f32.mxu0 %v3242_v19 }
 0x257   :  { %2410 = vmatprep.subr.bf16.mxu0 %v2799_v11 }
 0x259   :  { %2389 = vmatmul.mubr.f32.gmra.mrb[20].mxu0 %v3248_v21 }
 0x25a   :  { %2411 = vmatpush3.bf16.msra.mxu0 %v2799_v11  ;;  %2391 = vmatprep.mubr.f32.mxu0 %v3254_v22 }
 0x25b   :  { %2412 = vmatprep.subr.bf16.mxu0 %v2800_v12 }
 0x25d   :  { %2392 = vmatmul.mubr.f32.gmra.mrb[22].mxu0 %v3260_v24 }
 0x25e   :  { %2413 = vmatpush3.bf16.msra.mxu0 %v2800_v12  ;;  %2394 = vmatprep.mubr.f32.mxu0 %v3266_v25 }
 0x25f   :  { %2414 = vmatprep.subr.bf16.mxu0 %v2801_v13 }
 0x261   :  { %2395 = vmatmul.mubr.f32.gmra.mrb[24].mxu0 %v3272_v27 }
 0x262   :  { %2415 = vmatpush3.bf16.msra.mxu0 %v2801_v13  ;;  %2397 = vmatprep.mubr.f32.mxu0 %v3278_v28 }
 0x263   :  { %2416 = vmatprep.subr.bf16.mxu0 %v2802_v4 }
 0x265   :  { %2398 = vmatmul.mubr.f32.gmra.mrb[26].mxu0 %v3288_v30 }
 0x266   :  { %2417 = vmatpush3.bf16.msra.mxu0 %v2802_v4  ;;  %2400 = vmatprep.mubr.f32.mxu0 %v3293_v31 }
 0x267   :  { %2418 = vmatprep.subr.bf16.mxu0 %v2803_v20 }
 0x269   :  { %2401 = vmatmul.mubr.f32.gmra.mrb[28].mxu0 %v3300_v33 }
 0x26a   :  { %2419 = vmatpush3.bf16.msra.mxu0 %v2803_v20  ;;  %2403 = vmatprep.mubr.f32.mxu0 %v3305_v34 }
 0x26b   :  { %2420 = vmatprep.subr.bf16.mxu0 %v2804_v23 }
 0x26d   :  { %2404 = vmatmul.mubr.f32.gmra.mrb[30].mxu0 %v3314_v36 }
 0x26e   :  { %2421 = vmatpush3.bf16.msra.mxu0 %v2804_v23  ;;  %2422 = vmatprep.mubr.bf16.mxu0 %v3327_v17  ;;  %v2810_v17 = vld [vmem:[#allocation6 + $0x28] sm:$0xff]  }
 0x26f   :  { %2438 = vmatprep.subr.bf16.mxu0 %v2805_v26 }
 0x271   :  { %2423 = vmatmul.mubr.bf16.vlgmr.msra.gmra.mrb[32].mxu0 %v3325_v14  ;;  %v2811_v14 = vld [vmem:[#allocation6 + $0x30] sm:$0xff]  }
 0x272   :  { %2426 = vmatprep.mubr.bf16.mxu0 %v3335_v43  ;;  %2439 = vmatpush3.bf16.msra.mxu0 %v2805_v26 }
 0x273   :  { %2440 = vmatprep.subr.bf16.mxu0 %v2806_v29 }
 0x276   :  { %2441 = vmatpush3.bf16.msra.mxu0 %v2806_v29 }
 0x277   :  { %2442 = vmatprep.subr.bf16.mxu0 %v2807_v32 }
 0x279   :  { %2427 = vmatmul.mubr.bf16.gmra.mrb[36].mxu0 %v3332_v42 }
 0x27a   :  { %2430 = vmatprep.mubr.bf16.mxu0 %v3343_v57  ;;  %2443 = vmatpush3.bf16.msra.mxu0 %v2807_v32 }
 0x27b   :  { %2444 = vmatprep.subr.bf16.mxu0 %v2808_v35 }
 0x27e   :  { %2445 = vmatpush3.bf16.msra.mxu0 %v2808_v35 }
 0x27f   :  { %2446 = vmatprep.subr.bf16.mxu0 %v2809_v37 }
 0x281   :  { %2431 = vmatmul.mubr.bf16.gmra.mrb[40].mxu0 %v3340_v56 }
 0x282   :  { %2434 = vmatprep.mubr.bf16.mxu0 %v3351_v9  ;;  %2447 = vmatpush3.bf16.msra.mxu0 %v2809_v37 }
 0x283   :  { %2448 = vmatprep.subr.bf16.mxu0 %v2810_v17 }
 0x286   :  { %2449 = vmatpush3.bf16.msra.mxu0 %v2810_v17 }
 0x287   :  { %2450 = vmatprep.subr.bf16.mxu0 %v2811_v14 }
 0x289   :  { %2435 = vmatmul.mubr.bf16.gmra.mrb[44].mxu0 %v3348_v8 }
 0x28a   :  { %2451 = vmatpush3.bf16.msra.mxu0 %v2811_v14 }
 0x28b   :  { %2452 = vmatprep.subr.bf16.mxu0 %v2812_v38 }
 0x28e   :  { %2453 = vmatpush3.bf16.msra.mxu0 %v2812_v38 }
 0x28f   :  { %2558 = vmatprep.subr.bf16.mxu0 %v3380_v63 }
 0x324   :  { %v2384_v39 = vpop.f32.mrb[16].mxu0 }
 0x325   :  { %v840_v40 = vpop.f32.mrb[17].mxu0 }
 0x326   :  { %v919_v41 = vpack.c.bf16 %v2384_v39, %v840_v40 }
 0x328   :  { %v2387_v42 = vpop.f32.mrb[18].mxu0  ;;  %2454 = vmatprep.mubr.bf16.mxu0 %v919_v41 }
 0x329   :  { %v850_v43 = vpop.f32.mrb[19].mxu0 }
 0x32a   :  { %v920_v44 = vpack.c.bf16 %v2387_v42, %v850_v43 }
 0x32c   :  { %v2390_v45 = vpop.f32.mrb[20].mxu0  ;;  %2455 = vmatmul.mubr.bf16.vlgmr.msra.gmra.mrb[32].mxu0 %v920_v44 }
 0x32d   :  { %v860_v46 = vpop.f32.mrb[21].mxu0  ;;  %2559 = vmatpush3.bf16.msra.mxu0 %v3380_v63 }
 0x32e   :  { %v921_v47 = vpack.c.bf16 %v2390_v45, %v860_v46  ;;  %2560 = vmatprep.subr.bf16.mxu0 %v3382_v1 }
 0x330   :  { %v2393_v48 = vpop.f32.mrb[22].mxu0  ;;  %2458 = vmatprep.mubr.bf16.mxu0 %v921_v47 }
 0x331   :  { %v870_v49 = vpop.f32.mrb[23].mxu0  ;;  %2561 = vmatpush3.bf16.msra.mxu0 %v3382_v1 }
 0x332   :  { %v922_v50 = vpack.c.bf16 %v2393_v48, %v870_v49  ;;  %2562 = vmatprep.subr.bf16.mxu0 %v3387_v2 }
 0x334   :  { %v2396_v51 = vpop.f32.mrb[24].mxu0  ;;  %2459 = vmatmul.mubr.bf16.gmra.mrb[36].mxu0 %v922_v50 }
 0x335   :  { %v880_v52 = vpop.f32.mrb[25].mxu0  ;;  %2563 = vmatpush3.bf16.msra.mxu0 %v3387_v2 }
 0x336   :  { %v923_v53 = vpack.c.bf16 %v2396_v51, %v880_v52  ;;  %2564 = vmatprep.subr.bf16.mxu0 %v3391_v3 }
 0x338   :  { %v2399_v54 = vpop.f32.mrb[26].mxu0  ;;  %2462 = vmatprep.mubr.bf16.mxu0 %v923_v53 }
 0x339   :  { %v890_v55 = vpop.f32.mrb[27].mxu0  ;;  %2565 = vmatpush3.bf16.msra.mxu0 %v3391_v3 }
 0x33a   :  { %v924_v56 = vpack.c.bf16 %v2399_v54, %v890_v55  ;;  %2566 = vmatprep.subr.bf16.mxu0 %v3395_v5 }
 0x33c   :  { %v2402_v57 = vpop.f32.mrb[28].mxu0  ;;  %2463 = vmatmul.mubr.bf16.gmra.mrb[40].mxu0 %v924_v56 }
 0x33d   :  { %v900_v58 = vpop.f32.mrb[29].mxu0  ;;  %2567 = vmatpush3.bf16.msra.mxu0 %v3395_v5 }
 0x33e   :  { %v925_v59 = vpack.c.bf16 %v2402_v57, %v900_v58  ;;  %2568 = vmatprep.subr.bf16.mxu0 %v3399_v6 }
 0x340   :  { %v2405_v60 = vpop.f32.mrb[30].mxu0  ;;  %2466 = vmatprep.mubr.bf16.mxu0 %v925_v59 }
 0x341   :  { %v910_v61 = vpop.f32.mrb[31].mxu0  ;;  %2569 = vmatpush3.bf16.msra.mxu0 %v3399_v6 }
 0x342   :  { %v926_v62 = vpack.c.bf16 %v2405_v60, %v910_v61 }
 0x344   :  { %2467 = vmatmul.mubr.bf16.gmra.mrb[44].mxu0 %v926_v62 }
 0x3ff   :  { %v2456_v8 = vpop.f32.mrb[32].mxu0 }
 0x400   :  { %v1225_v9 = vadd.f32 %v2456_v8, %v2020_v7  ;;  %v1154_v10 = vpop.f32.mrb[33].mxu0 }
 0x401   :  { %v1223_v0 = vadd.f32 %v2020_v7, %v1154_v10  ;;  %v2457_v11 = vpop.f32.mrb[34].mxu0 }
 0x402   :  { %v1226_v12 = vadd.f32 %v2457_v11, %v2020_v7  ;;  %v1157_v13 = vpop.f32.mrb[35].mxu0  ;;  %v1241_v20 = vmax.f32 %v1225_v9, 0.0 }
 0x403   :  { %v1224_v4 = vadd.f32 %v2020_v7, %v1157_v13  ;;  %v1239_v26 = vmax.f32 %v1223_v0, 0.0 }
 0x404   :  { %v1242_v23 = vmax.f32 %v1226_v12, 0.0 }
 0x405   :  { %v1240_v29 = vmax.f32 %v1224_v4, 0.0 }
 0x406   :  { %v3407_v32 = vpack.c.bf16 %v1242_v23, %v1241_v20 }
 0x407   :  { %v3409_v35 = vpack.c.bf16 %v1240_v29, %v1239_v26  ;;  %v2460_v37 = vpop.f32.mrb[36].mxu0 }
 0x408   :  { %v1229_v17 = vadd.f32 %v2460_v37, %v2020_v7  ;;  %v1170_v14 = vpop.f32.mrb[37].mxu0 }
 0x409   :  { %v1227_v38 = vadd.f32 %v2020_v7, %v1170_v14  ;;  %v2461_v39 = vpop.f32.mrb[38].mxu0  ;;  %2655 = vmatprep.subr.bf16.mxu1 %v3409_v35  ;;  %v2813_v14 = vld [vmem:[%s3690_s9] sm:$0xff]  }
 0x40a   :  { %v1230_v40 = vadd.f32 %v2461_v39, %v2020_v7  ;;  %v1173_v41 = vpop.f32.mrb[39].mxu0  ;;  %2657 = vmatpush3.bf16.msra.mxu1 %v3409_v35  ;;  %v1245_v43 = vmax.f32 %v1229_v17, 0.0  ;;  %v2816_v39 = vld [vmem:[%s3690_s9 + $0x18] sm:$0xff]  }
 0x40b   :  { %v1228_v42 = vadd.f32 %v2020_v7, %v1173_v41  ;;  %2659 = vmatprep.subr.bf16.mxu1 %v3407_v32  ;;  %v1243_v45 = vmax.f32 %v1227_v38, 0.0  ;;  %v2815_v38 = vld [vmem:[%s3690_s9 + $0x10] sm:$0xff]  }
 0x40c   :  { %v1246_v44 = vmax.f32 %v1230_v40, 0.0 }
 0x40d   :  { %v1244_v46 = vmax.f32 %v1228_v42, 0.0 }
 0x40e   :  { %v3414_v47 = vpack.c.bf16 %v1246_v44, %v1245_v43  ;;  %2661 = vmatpush3.bf16.msra.mxu1 %v3407_v32 }
 0x40f   :  { %v3417_v48 = vpack.c.bf16 %v1244_v46, %v1243_v45  ;;  %v2464_v49 = vpop.f32.mrb[40].mxu0 }
 0x410   :  { %v1233_v50 = vadd.f32 %v2464_v49, %v2020_v7  ;;  %v1186_v51 = vpop.f32.mrb[41].mxu0 }
 0x411   :  { %v1231_v52 = vadd.f32 %v2020_v7, %v1186_v51  ;;  %v2465_v53 = vpop.f32.mrb[42].mxu0  ;;  %2663 = vmatprep.subr.bf16.mxu1 %v3417_v48 }
 0x412   :  { %v1234_v54 = vadd.f32 %v2465_v53, %v2020_v7  ;;  %v1189_v55 = vpop.f32.mrb[43].mxu0  ;;  %2665 = vmatpush3.bf16.msra.mxu1 %v3417_v48  ;;  %v1249_v57 = vmax.f32 %v1233_v50, 0.0 }
 0x413   :  { %v1232_v56 = vadd.f32 %v2020_v7, %v1189_v55  ;;  %2667 = vmatprep.subr.bf16.mxu1 %v3414_v47  ;;  %v1247_v59 = vmax.f32 %v1231_v52, 0.0  ;;  %v1777_v55 = vlaneseq }
 0x414   :  { %v1250_v58 = vmax.f32 %v1234_v54, 0.0 }
 0x415   :  { %v1248_v60 = vmax.f32 %v1232_v56, 0.0  ;;  %v3493_v56 = vand.u32 127, %v1777_v55 }
 0x416   :  { %v3422_v61 = vpack.c.bf16 %v1250_v58, %v1249_v57  ;;  %2669 = vmatpush3.bf16.msra.mxu1 %v3414_v47  ;;  %v3498_v58 = vld [vmem:[%s3691_s10] ss:$0 sm:$0xff] }
 0x417   :  { %v3425_v62 = vpack.c.bf16 %v1248_v60, %v1247_v59  ;;  %v2468_v8 = vpop.f32.mrb[44].mxu0  ;;  %vm1779_vm0 = vcmp.lt.s32.totalorder %v3493_v56, 8 }
 0x418   :  { %v1237_v9 = vadd.f32 %v2468_v8, %v2020_v7  ;;  %v1202_v10 = vpop.f32.mrb[45].mxu0 }
 0x419   :  { %v1235_v0 = vadd.f32 %v2020_v7, %v1202_v10  ;;  %v2469_v11 = vpop.f32.mrb[46].mxu0  ;;  %2671 = vmatprep.subr.bf16.mxu1 %v3425_v62 }
 0x41a   :  { %v1238_v12 = vadd.f32 %v2469_v11, %v2020_v7  ;;  %v1205_v13 = vpop.f32.mrb[47].mxu0  ;;  %2673 = vmatpush3.bf16.msra.mxu1 %v3425_v62  ;;  %v1253_v20 = vmax.f32 %v1237_v9, 0.0 }
 0x41b   :  { %v1236_v4 = vadd.f32 %v2020_v7, %v1205_v13  ;;  %2675 = vmatprep.subr.bf16.mxu1 %v3422_v61  ;;  %v1251_v26 = vmax.f32 %v1235_v0, 0.0  ;;  %v2814_v7 = vld [vmem:[%s3690_s9 + $0x8] sm:$0xff]  }
 0x41c   :  { %v1254_v23 = vmax.f32 %v1238_v12, 0.0 }
 0x41d   :  { %v1252_v29 = vmax.f32 %v1236_v4, 0.0 }
 0x41e   :  { %v3430_v37 = vpack.c.bf16 %v1254_v23, %v1253_v20  ;;  %2677 = vmatpush3.bf16.msra.mxu1 %v3422_v61 }
 0x41f   :  { %v1261_v17 = vpack.c.bf16 %v1252_v29, %v1251_v26 }
 0x421   :  { %2679 = vmatprep.subr.bf16.mxu1 %v1261_v17 }
 0x422   :  { %2681 = vmatpush3.bf16.msra.mxu1 %v1261_v17 }
 0x423   :  { %2683 = vmatprep.subr.bf16.mxu1 %v3430_v37 }
 0x426   :  { %2685 = vmatpush3.bf16.msra.mxu1 %v3430_v37 }
 0x427   :  { %2526 = vmatprep.subr.bf16.mxu1 %v2813_v14 }
 0x429   :  { %2503 = vmatmul.mubr.f32.vlgmr.msra.gmra.mrb[16].mxu1 %v3225_v15  ;;  %v2817_v15 = vld [vmem:[%s3690_s9 + $0x20] sm:$0xff]  }
 0x42a   :  { %2527 = vmatpush3.bf16.msra.mxu1 %v2813_v14  ;;  %2505 = vmatprep.mubr.f32.mxu1 %v3230_v16  ;;  %v2818_v16 = vld [vmem:[%s3690_s9 + $0x28] sm:$0xff]  }
 0x42b   :  { %2528 = vmatprep.subr.bf16.mxu1 %v2814_v7 }
 0x42d   :  { %2506 = vmatmul.mubr.f32.gmra.mrb[18].mxu1 %v3236_v18  ;;  %v2819_v18 = vld [vmem:[%s3690_s9 + $0x30] sm:$0xff]  }
 0x42e   :  { %2529 = vmatpush3.bf16.msra.mxu1 %v2814_v7  ;;  %2508 = vmatprep.mubr.f32.mxu1 %v3242_v19  ;;  %v2820_v19 = vld [vmem:[%s3690_s9 + $0x38] sm:$0xff]  }
 0x42f   :  { %2530 = vmatprep.subr.bf16.mxu1 %v2815_v38 }
 0x431   :  { %2509 = vmatmul.mubr.f32.gmra.mrb[20].mxu1 %v3248_v21  ;;  %v2827_v21 = vld [vmem:[#allocation9 + $0x30] sm:$0xff]  }
 0x432   :  { %2531 = vmatpush3.bf16.msra.mxu1 %v2815_v38  ;;  %2511 = vmatprep.mubr.f32.mxu1 %v3254_v22  ;;  %v2828_v22 = vld [vmem:[#allocation9 + $0x38] sm:$0xff]  }
 0x433   :  { %2532 = vmatprep.subr.bf16.mxu1 %v2816_v39  ;;  %2570 = vmatprep.subr.bf16.mxu0 %v2827_v21 }
 0x434   :  { %2571 = vmatpush3.bf16.msra.mxu0 %v2827_v21 }
 0x435   :  { %2512 = vmatmul.mubr.f32.gmra.mrb[22].mxu1 %v3260_v24  ;;  %2572 = vmatprep.subr.bf16.mxu0 %v2828_v22 }
 0x436   :  { %2533 = vmatpush3.bf16.msra.mxu1 %v2816_v39  ;;  %2514 = vmatprep.mubr.f32.mxu1 %v3266_v25 }
 0x437   :  { %2534 = vmatprep.subr.bf16.mxu1 %v2817_v15 }
 0x438   :  { %2573 = vmatpush3.bf16.msra.mxu0 %v2828_v22 }
 0x439   :  { %2515 = vmatmul.mubr.f32.gmra.mrb[24].mxu1 %v3272_v27 }
 0x43a   :  { %2535 = vmatpush3.bf16.msra.mxu1 %v2817_v15  ;;  %2517 = vmatprep.mubr.f32.mxu1 %v3278_v28 }
 0x43b   :  { %2536 = vmatprep.subr.bf16.mxu1 %v2818_v16 }
 0x43d   :  { %2518 = vmatmul.mubr.f32.gmra.mrb[26].mxu1 %v3288_v30 }
 0x43e   :  { %2537 = vmatpush3.bf16.msra.mxu1 %v2818_v16  ;;  %2520 = vmatprep.mubr.f32.mxu1 %v3293_v31 }
 0x43f   :  { %2538 = vmatprep.subr.bf16.mxu1 %v2819_v18 }
 0x441   :  { %2521 = vmatmul.mubr.f32.gmra.mrb[28].mxu1 %v3300_v33 }
 0x442   :  { %2539 = vmatpush3.bf16.msra.mxu1 %v2819_v18  ;;  %2523 = vmatprep.mubr.f32.mxu1 %v3305_v34 }
 0x443   :  { %2540 = vmatprep.subr.bf16.mxu1 %v2820_v19 }
 0x445   :  { %2524 = vmatmul.mubr.f32.gmra.mrb[30].mxu1 %v3314_v36 }
 0x446   :  { %2541 = vmatpush3.bf16.msra.mxu1 %v2820_v19  ;;  %2542 = vmatprep.mubr.bf16.mxu1 %v3409_v35 }
 0x447   :  { %2686 = vmatprep.subr.bf16.mxu1 %v3380_v63 }
 0x449   :  { %2543 = vmatmul.mubr.bf16.vlgmr.msra.gmra.mrb[32].mxu1 %v3407_v32 }
 0x44a   :  { %2546 = vmatprep.mubr.bf16.mxu1 %v3417_v48  ;;  %2694 = vmatpush3.bf16.msra.mxu1 %v3380_v63 }
 0x44b   :  { %2687 = vmatprep.subr.bf16.mxu1 %v3382_v1 }
 0x44e   :  { %2695 = vmatpush3.bf16.msra.mxu1 %v3382_v1 }
 0x44f   :  { %2688 = vmatprep.subr.bf16.mxu1 %v3387_v2 }
 0x451   :  { %2547 = vmatmul.mubr.bf16.gmra.mrb[36].mxu1 %v3414_v47 }
 0x452   :  { %2550 = vmatprep.mubr.bf16.mxu1 %v3425_v62  ;;  %2696 = vmatpush3.bf16.msra.mxu1 %v3387_v2 }
 0x453   :  { %2689 = vmatprep.subr.bf16.mxu1 %v3391_v3 }
 0x456   :  { %2697 = vmatpush3.bf16.msra.mxu1 %v3391_v3 }
 0x457   :  { %2690 = vmatprep.subr.bf16.mxu1 %v3395_v5 }
 0x459   :  { %2551 = vmatmul.mubr.bf16.gmra.mrb[40].mxu1 %v3422_v61 }
 0x45a   :  { %2554 = vmatprep.mubr.bf16.mxu1 %v1261_v17  ;;  %2698 = vmatpush3.bf16.msra.mxu1 %v3395_v5 }
 0x45b   :  { %2691 = vmatprep.subr.bf16.mxu1 %v3399_v6 }
 0x45e   :  { %2699 = vmatpush3.bf16.msra.mxu1 %v3399_v6 }
 0x45f   :  { %2692 = vmatprep.subr.bf16.mxu1 %v2827_v21 }
 0x461   :  { %2555 = vmatmul.mubr.bf16.gmra.mrb[44].mxu1 %v3430_v37 }
 0x462   :  { %2700 = vmatpush3.bf16.msra.mxu1 %v2827_v21 }
 0x463   :  { %2693 = vmatprep.subr.bf16.mxu1 %v2828_v22 }
 0x466   :  { %2701 = vmatpush3.bf16.msra.mxu1 %v2828_v22 }
 0x4fc   :  { %v2504_v24 = vpop.f32.mrb[16].mxu1 }
 0x4fd   :  { %v1378_v25 = vpop.f32.mrb[17].mxu1 }
 0x4fe   :  { %v1457_v27 = vpack.c.bf16 %v2504_v24, %v1378_v25 }
 0x500   :  { %v2507_v28 = vpop.f32.mrb[18].mxu1  ;;  %2574 = vmatprep.mubr.bf16.mxu0 %v1457_v27 }
 0x501   :  { %v1388_v30 = vpop.f32.mrb[19].mxu1 }
 0x502   :  { %v1458_v31 = vpack.c.bf16 %v2507_v28, %v1388_v30 }
 0x504   :  { %2575 = vmatmul.mubr.bf16.vlgmr.msra.gmra.mrb[48].mxu0 %v1458_v31  ;;  %v2510_v33 = vpop.f32.mrb[20].mxu1 }
 0x505   :  { %v1398_v34 = vpop.f32.mrb[21].mxu1 }
 0x506   :  { %v1459_v36 = vpack.c.bf16 %v2510_v33, %v1398_v34 }
 0x508   :  { %v2513_v63 = vpop.f32.mrb[22].mxu1  ;;  %2578 = vmatprep.mubr.bf16.mxu0 %v1459_v36 }
 0x509   :  { %v1408_v1 = vpop.f32.mrb[23].mxu1 }
 0x50a   :  { %v1460_v2 = vpack.c.bf16 %v2513_v63, %v1408_v1 }
 0x50c   :  { %2579 = vmatmul.mubr.bf16.gmra.mrb[52].mxu0 %v1460_v2  ;;  %v2516_v3 = vpop.f32.mrb[24].mxu1 }
 0x50d   :  { %v1418_v5 = vpop.f32.mrb[25].mxu1 }
 0x50e   :  { %v1461_v6 = vpack.c.bf16 %v2516_v3, %v1418_v5 }
 0x510   :  { %v2519_v32 = vpop.f32.mrb[26].mxu1  ;;  %2582 = vmatprep.mubr.bf16.mxu1 %v1461_v6 }
 0x511   :  { %v1428_v35 = vpop.f32.mrb[27].mxu1 }
 0x512   :  { %v1462_v40 = vpack.c.bf16 %v2519_v32, %v1428_v35 }
 0x514   :  { %2583 = vmatmul.mubr.bf16.vlgmr.msra.gmra.mrb[40].mxu1 %v1462_v40  ;;  %v2522_v41 = vpop.f32.mrb[28].mxu1 }
 0x515   :  { %v1438_v42 = vpop.f32.mrb[29].mxu1 }
 0x516   :  { %v1463_v43 = vpack.c.bf16 %v2522_v41, %v1438_v42 }
 0x518   :  { %v2525_v44 = vpop.f32.mrb[30].mxu1  ;;  %2586 = vmatprep.mubr.bf16.mxu1 %v1463_v43 }
 0x519   :  { %v1448_v45 = vpop.f32.mrb[31].mxu1 }
 0x51a   :  { %v1464_v46 = vpack.c.bf16 %v2525_v44, %v1448_v45 }
 0x51c   :  { %v2544_v47 = vpop.f32.mrb[32].mxu1  ;;  %2587 = vmatmul.mubr.bf16.gmra.mrb[44].mxu1 %v1464_v46 }
 0x51d   :  { %v1547_v48 = vpop.f32.mrb[33].mxu1 }
 0x51e   :  { %v2545_v49 = vpop.f32.mrb[34].mxu1 }
 0x51f   :  { %v1550_v50 = vpop.f32.mrb[35].mxu1 }
 0x524   :  { %v2548_v51 = vpop.f32.mrb[36].mxu1 }
 0x525   :  { %v1563_v52 = vpop.f32.mrb[37].mxu1 }
 0x526   :  { %v2549_v53 = vpop.f32.mrb[38].mxu1 }
 0x527   :  { %v1566_v54 = vpop.f32.mrb[39].mxu1 }
 0x5d7   :  { %v2576_v57 = vpop.f32.mrb[48].mxu0 }
 0x5d8   :  { %v1701_v59 = vadd.f32 %v2576_v57, %v2544_v47  ;;  %v1692_v60 = vpop.f32.mrb[49].mxu0 }
 0x5d9   :  { %v1693_v61 = vadd.f32 %v1692_v60, %v1547_v48  ;;  %v2577_v62 = vpop.f32.mrb[50].mxu0 }
 0x5da   :  { %v1704_v8 = vadd.f32 %v2577_v62, %v2545_v49  ;;  %v1695_v9 = vpop.f32.mrb[51].mxu0  ;;  %v1763_v10 = vadd.f32 %v3498_v58, %v1701_v59 }
 0x5db   :  { %v1696_v0 = vadd.f32 %v1695_v9, %v1550_v50  ;;  %v1761_v11 = vadd.f32 %v3498_v58, %v1693_v61 }
 0x5dc   :  { %v3505_v12 = vsel %vm1779_vm0, %v1763_v10, -1e+30  ;;  %v1764_v13 = vadd.f32 %v3498_v58, %v1704_v8 }
 0x5dd   :  { %1800 = vmax.xlane.f32.xlu1 %v3505_v12  ;;  %v1780_v4 = vsel %vm1779_vm0, %v1761_v11, -1e+30  ;;  %v1762_v20 = vadd.f32 %v3498_v58, %v1696_v0 }
 0x5de   :  { %1796 = vmax.xlane.f32.xlu0 %v1780_v4  ;;  %v1783_v37 = vsel %vm1779_vm0, %v1764_v13, -1e+30 }
 0x5df   :  { %v2580_v23 = vpop.f32.mrb[52].mxu0  ;;  %v1781_v7 = vsel %vm1779_vm0, %v1762_v20, -1e+30 }
 0x5e0   :  { %v1717_v26 = vadd.f32 %v2580_v23, %v2548_v51  ;;  %v1708_v29 = vpop.f32.mrb[53].mxu0 }
 0x5e1   :  { %v1709_v17 = vadd.f32 %v1708_v29, %v1563_v52  ;;  %v2581_v14 = vpop.f32.mrb[54].mxu0  ;;  %1802 = vmax.xlane.f32.xlu1 %v1783_v37 }
 0x5e2   :  { %v1720_v38 = vadd.f32 %v2581_v14, %v2549_v53  ;;  %v1711_v39 = vpop.f32.mrb[55].mxu0  ;;  %1798 = vmax.xlane.f32.xlu0 %v1781_v7  ;;  %v1767_v15 = vadd.f32 %v3498_v58, %v1717_v26 }
 0x5e3   :  { %v1712_v16 = vadd.f32 %v1711_v39, %v1566_v54  ;;  %v1765_v21 = vadd.f32 %v3498_v58, %v1709_v17 }
 0x5e4   :  { %v1786_v18 = vsel %vm1779_vm0, %v1767_v15, -1e+30  ;;  %v1768_v19 = vadd.f32 %v3498_v58, %v1720_v38 }
 0x5e5   :  { %v1766_v24 = vadd.f32 %v3498_v58, %v1712_v16  ;;  %v1784_v31 = vsel %vm1779_vm0, %v1765_v21, -1e+30 }
 0x5e6   :  { %1808 = vmax.xlane.f32.xlu0 %v1786_v18  ;;  %v1787_v22 = vsel %vm1779_vm0, %v1768_v19, -1e+30 }
 0x5e7   :  { %1810 = vmax.xlane.f32.xlu1 %v1787_v22  ;;  %v2584_v25 = vpop.f32.mrb[40].mxu1  ;;  %v1785_v36 = vsel %vm1779_vm0, %v1766_v24, -1e+30 }
 0x5e8   :  { %v1724_v27 = vpop.f32.mrb[41].mxu1  ;;  %v1771_v28 = vadd.f32 %v2584_v25, %v3498_v58 }
 0x5e9   :  { %v2585_v30 = vpop.f32.mrb[42].mxu1  ;;  %v1769_v63 = vadd.f32 %v3498_v58, %v1724_v27 }
 0x5ea   :  { %v1772_v33 = vadd.f32 %v2585_v30, %v3498_v58  ;;  %1804 = vmax.xlane.f32.xlu0 %v1784_v31  ;;  %v1727_v34 = vpop.f32.mrb[43].mxu1  ;;  %v1790_v1 = vsel %vm1779_vm0, %v1771_v28, -1e+30 }
 0x5eb   :  { %1806 = vmax.xlane.f32.xlu1 %v1785_v36  ;;  %v1770_v2 = vadd.f32 %v3498_v58, %v1727_v34  ;;  %v1788_v40 = vsel %vm1779_vm0, %v1769_v63, -1e+30 }
 0x5ec   :  { %v1791_v3 = vsel %vm1779_vm0, %v1772_v33, -1e+30 }
 0x5ed   :  { %v1789_v42 = vsel %vm1779_vm0, %v1770_v2, -1e+30 }
 0x5ee   :  { %1816 = vmax.xlane.f32.xlu0 %v1790_v1 }
 0x5ef   :  { %1818 = vmax.xlane.f32.xlu1 %v1791_v3  ;;  %v2588_v5 = vpop.f32.mrb[44].mxu1 }
 0x5f0   :  { %v1740_v6 = vpop.f32.mrb[45].mxu1  ;;  %v1775_v44 = vadd.f32 %v2588_v5, %v3498_v58 }
 0x5f1   :  { %v1773_v32 = vadd.f32 %v3498_v58, %v1740_v6  ;;  %v2589_v35 = vpop.f32.mrb[46].mxu1 }
 0x5f2   :  { %1812 = vmax.xlane.f32.xlu0 %v1788_v40  ;;  %v1743_v41 = vpop.f32.mrb[47].mxu1  ;;  %v1776_v47 = vadd.f32 %v2589_v35, %v3498_v58  ;;  %v3556_v48 = vsel %vm1779_vm0, %v1775_v44, -1e+30 }
 0x5f3   :  { %v1774_v43 = vadd.f32 %v3498_v58, %v1743_v41  ;;  %1814 = vmax.xlane.f32.xlu1 %v1789_v42  ;;  %v3545_v45 = vsel %vm1779_vm0, %v1773_v32, -1e+30 }
 0x5f4   :  { %v3561_v49 = vsel %vm1779_vm0, %v1776_v47, -1e+30 }
 0x5f5   :  { %v3549_v46 = vsel %vm1779_vm0, %v1774_v43, -1e+30 }
 0x5f6   :  { %1820 = vmax.xlane.f32.xlu0 %v3545_v45 }
 0x5f7   :  { %1822 = vmax.xlane.f32.xlu1 %v3549_v46 }
 0x5fa   :  { %1824 = vmax.xlane.f32.xlu0 %v3556_v48 }
 0x5fb   :  { %1826 = vmax.xlane.f32.xlu1 %v3561_v49 }
 0x66a   :  { %v1801_v50 = vpop.xlane.xlu1 %1800 }
 0x66b   :  { %v3565_v51 = vsub.f32 %v3505_v12, %v1801_v50  ;;  %v1797_v52 = vpop.xlane.xlu0 %1796 }
 0x66c   :  { %v3567_v53 = vsub.f32 %v1780_v4, %v1797_v52 }
 0x66d   :  { %v1848_v54 = vmul.f32 1.442695, %v3565_v51 }
 0x66e   :  { %v1844_v55 = vmul.f32 1.442695, %v3567_v53  ;;  %v1803_v57 = vpop.xlane.xlu1 %1802 }
 0x66f   :  { %2829 = vpow2.f32 %v1848_v54  ;;  %v3571_v58 = vsub.f32 %v1783_v37, %v1803_v57  ;;  %v1799_v56 = vpop.xlane.xlu0 %1798 }
 0x670   :  { %v3573_v59 = vsub.f32 %v1781_v7, %v1799_v56  ;;  %2831 = vpow2.f32 %v1844_v55 }
 0x671   :  { %v1850_v60 = vmul.f32 1.442695, %v3571_v58 }
 0x672   :  { %v1846_v61 = vmul.f32 1.442695, %v3573_v59 }
 0x673   :  { %2833 = vpow2.f32 %v1850_v60  ;;  %v1809_v62 = vpop.xlane.xlu0 %1808 }
 0x674   :  { %v3577_v8 = vsub.f32 %v1786_v18, %v1809_v62  ;;  %v1811_v9 = vpop.xlane.xlu1 %1810  ;;  %2835 = vpow2.f32 %v1846_v61 }
 0x675   :  { %v3579_v10 = vsub.f32 %v1787_v22, %v1811_v9 }
 0x676   :  { %v1856_v0 = vmul.f32 1.442695, %v3577_v8 }
 0x677   :  { %v1858_v11 = vmul.f32 1.442695, %v3579_v10  ;;  %v1805_v12 = vpop.xlane.xlu0 %1804 }
 0x678   :  { %2837 = vpow2.f32 %v1856_v0  ;;  %v3583_v13 = vsub.f32 %v1784_v31, %v1805_v12  ;;  %v1807_v4 = vpop.xlane.xlu1 %1806 }
 0x679   :  { %v2830_v20 = vpop.eup %2829  ;;  %v3585_v23 = vsub.f32 %v1785_v36, %v1807_v4  ;;  %2839 = vpow2.f32 %v1858_v11 }
 0x67a   :  { %v1852_v26 = vmul.f32 1.442695, %v3583_v13  ;;  %1880 = vadd.xlane.f32.xlu0 %v2830_v20  ;;  %v2832_v17 = vpop.eup %2831 }
 0x67b   :  { %v1854_v29 = vmul.f32 1.442695, %v3585_v23  ;;  %v1817_v37 = vpop.xlane.xlu0 %1816 }
 0x67c   :  { %2841 = vpow2.f32 %v1852_v26  ;;  %v3589_v14 = vsub.f32 %v1790_v1, %v1817_v37  ;;  %v1819_v7 = vpop.xlane.xlu1 %1818 }
 0x67d   :  { %v2834_v38 = vpop.eup %2833  ;;  %v3591_v39 = vsub.f32 %v1791_v3, %v1819_v7  ;;  %2843 = vpow2.f32 %v1854_v29 }
 0x67e   :  { %v1864_v15 = vmul.f32 1.442695, %v3589_v14  ;;  %1876 = vadd.xlane.f32.xlu0 %v2832_v17  ;;  %1882 = vadd.xlane.f32.xlu1 %v2834_v38  ;;  %v2836_v22 = vpop.eup %2835 }
 0x67f   :  { %v1866_v16 = vmul.f32 1.442695, %v3591_v39  ;;  %v1813_v18 = vpop.xlane.xlu0 %1812 }
 0x680   :  { %2845 = vpow2.f32 %v1864_v15  ;;  %v3595_v19 = vsub.f32 %v1788_v40, %v1813_v18  ;;  %v1815_v21 = vpop.xlane.xlu1 %1814 }
 0x681   :  { %v3597_v24 = vsub.f32 %v1789_v42, %v1815_v21  ;;  %2847 = vpow2.f32 %v1866_v16 }
 0x682   :  { %v2838_v25 = vpop.eup %2837  ;;  %v1860_v27 = vmul.f32 1.442695, %v3595_v19  ;;  %1878 = vadd.xlane.f32.xlu1 %v2836_v22 }
 0x683   :  { %v1862_v28 = vmul.f32 1.442695, %v3597_v24  ;;  %1888 = vadd.xlane.f32.xlu0 %v2838_v25  ;;  %v1821_v30 = vpop.xlane.xlu0 %1820  ;;  %v2840_v34 = vpop.eup %2839 }
 0x684   :  { %2849 = vpow2.f32 %v1860_v27  ;;  %v3602_v31 = vsub.f32 %v3545_v45, %v1821_v30  ;;  %v1823_v33 = vpop.xlane.xlu1 %1822 }
 0x685   :  { %v3605_v36 = vsub.f32 %v3549_v46, %v1823_v33  ;;  %2851 = vpow2.f32 %v1862_v28 }
 0x686   :  { %v2842_v63 = vpop.eup %2841  ;;  %v1868_v1 = vmul.f32 1.442695, %v3602_v31  ;;  %1890 = vadd.xlane.f32.xlu1 %v2840_v34 }
 0x687   :  { %v1870_v2 = vmul.f32 1.442695, %v3605_v36  ;;  %1884 = vadd.xlane.f32.xlu0 %v2842_v63  ;;  %v1825_v3 = vpop.xlane.xlu0 %1824  ;;  %v2844_v32 = vpop.eup %2843 }
 0x688   :  { %2853 = vpow2.f32 %v1868_v1  ;;  %v3610_v5 = vsub.f32 %v3556_v48, %v1825_v3  ;;  %v1827_v6 = vpop.xlane.xlu1 %1826 }
 0x689   :  { %v3613_v35 = vsub.f32 %v3561_v49, %v1827_v6  ;;  %2855 = vpow2.f32 %v1870_v2 }
 0x68a   :  { %v2846_v40 = vpop.eup %2845  ;;  %v1872_v41 = vmul.f32 1.442695, %v3610_v5  ;;  %1886 = vadd.xlane.f32.xlu1 %v2844_v32 }
 0x68b   :  { %v1874_v42 = vmul.f32 1.442695, %v3613_v35  ;;  %1896 = vadd.xlane.f32.xlu0 %v2846_v40  ;;  %v2848_v43 = vpop.eup %2847 }
 0x68c   :  { %2857 = vpow2.f32 %v1872_v41 }
 0x68d   :  { %2859 = vpow2.f32 %v1874_v42 }
 0x68e   :  { %v2850_v44 = vpop.eup %2849  ;;  %1898 = vadd.xlane.f32.xlu1 %v2848_v43 }
 0x68f   :  { %1892 = vadd.xlane.f32.xlu0 %v2850_v44  ;;  %v2852_v45 = vpop.eup %2851 }
 0x692   :  { %v2854_v46 = vpop.eup %2853  ;;  %1894 = vadd.xlane.f32.xlu1 %v2852_v45 }
 0x693   :  { %1900 = vadd.xlane.f32.xlu0 %v2854_v46  ;;  %v2856_v47 = vpop.eup %2855 }
 0x696   :  { %v2858_v48 = vpop.eup %2857  ;;  %1902 = vadd.xlane.f32.xlu1 %v2856_v47 }
 0x697   :  { %1904 = vadd.xlane.f32.xlu0 %v2858_v48  ;;  %v2860_v49 = vpop.eup %2859 }
 0x69a   :  { %1906 = vadd.xlane.f32.xlu1 %v2860_v49 }
 0x707   :  { %v1881_v50 = vpop.xlane.xlu0 %1880 }
 0x708   :  { %2861 = vlog2.f32 %v1881_v50 }
 0x70b   :  { %v1877_v52 = vpop.xlane.xlu0 %1876  ;;  %v1883_v54 = vpop.xlane.xlu1 %1882 }
 0x70c   :  { %2863 = vlog2.f32 %v1877_v52 }
 0x70d   :  { %2865 = vlog2.f32 %v1883_v54 }
 0x70f   :  { %v1879_v55 = vpop.xlane.xlu1 %1878 }
 0x710   :  { %2867 = vlog2.f32 %v1879_v55  ;;  %v1889_v57 = vpop.xlane.xlu0 %1888 }
 0x711   :  { %2869 = vlog2.f32 %v1889_v57 }
 0x712   :  { %v2862_v56 = vpop.eup %2861 }
 0x713   :  { %v1913_v60 = vmul.f32 0.6931472, %v2862_v56  ;;  %v1891_v61 = vpop.xlane.xlu1 %1890 }
 0x714   :  { %2871 = vlog2.f32 %v1891_v61  ;;  %v1885_v62 = vpop.xlane.xlu0 %1884 }
 0x715   :  { %v1942_v9 = vsub.f32 %v3565_v51, %v1913_v60  ;;  %2873 = vlog2.f32 %v1885_v62 }
 0x716   :  { %v2864_v0 = vpop.eup %2863 }
 0x717   :  { %v2866_v11 = vpop.eup %2865  ;;  %1958 = vst [vmem:[%s3692_s11 + $0x10] sm:$0xff] %v1942_v9  ;;  %v1909_v12 = vmul.f32 0.6931472, %v2864_v0  ;;  %v1887_v4 = vpop.xlane.xlu1 %1886 }
 0x718   :  { %v1915_v20 = vmul.f32 0.6931472, %v2866_v11  ;;  %2875 = vlog2.f32 %v1887_v4  ;;  %v1897_v26 = vpop.xlane.xlu0 %1896 }
 0x719   :  { %v1940_v29 = vsub.f32 %v3567_v53, %v1909_v12  ;;  %2877 = vlog2.f32 %v1897_v26 }
 0x71a   :  { %v2868_v37 = vpop.eup %2867  ;;  %v1943_v17 = vsub.f32 %v3571_v58, %v1915_v20 }
 0x71b   :  { %v2870_v7 = vpop.eup %2869  ;;  %1956 = vst [vmem:[%s3692_s11] sm:$0xff] %v1940_v29  ;;  %v1911_v51 = vmul.f32 0.6931472, %v2868_v37  ;;  %v1899_v38 = vpop.xlane.xlu1 %1898 }
 0x71c   :  { %1959 = vst [vmem:[%s3692_s11 + $0x18] sm:$0xff] %v1943_v17  ;;  %v1921_v15 = vmul.f32 0.6931472, %v2870_v7  ;;  %2879 = vlog2.f32 %v1899_v38  ;;  %v1893_v16 = vpop.xlane.xlu0 %1892 }
 0x71d   :  { %v1941_v53 = vsub.f32 %v3573_v59, %v1911_v51  ;;  %2881 = vlog2.f32 %v1893_v16 }
 0x71e   :  { %v2872_v18 = vpop.eup %2871  ;;  %v1946_v58 = vsub.f32 %v3577_v8, %v1921_v15 }
 0x71f   :  { %v2874_v21 = vpop.eup %2873  ;;  %1957 = vst [vmem:[%s3692_s11 + $0x8] sm:$0xff] %v1941_v53  ;;  %v1923_v22 = vmul.f32 0.6931472, %v2872_v18  ;;  %v1895_v25 = vpop.xlane.xlu1 %1894 }
 0x720   :  { %1962 = vst [vmem:[%s3692_s11 + $0x30] sm:$0xff] %v1946_v58  ;;  %v1917_v27 = vmul.f32 0.6931472, %v2874_v21  ;;  %2883 = vlog2.f32 %v1895_v25  ;;  %v1901_v28 = vpop.xlane.xlu0 %1900 }
 0x721   :  { %v1947_v59 = vsub.f32 %v3579_v10, %v1923_v22  ;;  %2885 = vlog2.f32 %v1901_v28 }
 0x722   :  { %v2876_v30 = vpop.eup %2875  ;;  %v1944_v8 = vsub.f32 %v3583_v13, %v1917_v27 }
 0x723   :  { %v2878_v33 = vpop.eup %2877  ;;  %1963 = vst [vmem:[%s3692_s11 + $0x38] sm:$0xff] %v1947_v59  ;;  %v1919_v34 = vmul.f32 0.6931472, %v2876_v30  ;;  %v1903_v63 = vpop.xlane.xlu1 %1902 }
 0x724   :  { %1960 = vst [vmem:[%s3692_s11 + $0x20] sm:$0xff] %v1944_v8  ;;  %v1929_v1 = vmul.f32 0.6931472, %v2878_v33  ;;  %2887 = vlog2.f32 %v1903_v63  ;;  %v1905_v2 = vpop.xlane.xlu0 %1904 }
 0x725   :  { %v1945_v10 = vsub.f32 %v3585_v23, %v1919_v34  ;;  %2889 = vlog2.f32 %v1905_v2 }
 0x726   :  { %v2880_v3 = vpop.eup %2879  ;;  %v1950_v13 = vsub.f32 %v3589_v14, %v1929_v1 }
 0x727   :  { %v2882_v6 = vpop.eup %2881  ;;  %1961 = vst [vmem:[%s3692_s11 + $0x28] sm:$0xff] %v1945_v10  ;;  %v1931_v32 = vmul.f32 0.6931472, %v2880_v3  ;;  %v1907_v40 = vpop.xlane.xlu1 %1906 }
 0x728   :  { %1966 = vst [vmem:[%s3692_s11 + $0x50] sm:$0xff] %v1950_v13  ;;  %v1925_v41 = vmul.f32 0.6931472, %v2882_v6  ;;  %2891 = vlog2.f32 %v1907_v40 }
 0x729   :  { %v1951_v42 = vsub.f32 %v3591_v39, %v1931_v32 }
 0x72a   :  { %v2884_v23 = vpop.eup %2883  ;;  %v1948_v43 = vsub.f32 %v3595_v19, %v1925_v41 }
 0x72b   :  { %v2886_v44 = vpop.eup %2885  ;;  %1967 = vst [vmem:[%s3692_s11 + $0x58] sm:$0xff] %v1951_v42  ;;  %v1927_v14 = vmul.f32 0.6931472, %v2884_v23 }
 0x72c   :  { %1964 = vst [vmem:[%s3692_s11 + $0x40] sm:$0xff] %v1948_v43  ;;  %v1933_v45 = vmul.f32 0.6931472, %v2886_v44 }
 0x72d   :  { %v1949_v46 = vsub.f32 %v3597_v24, %v1927_v14 }
 0x72e   :  { %v2888_v47 = vpop.eup %2887  ;;  %v1952_v48 = vsub.f32 %v3602_v31, %v1933_v45 }
 0x72f   :  { %v2890_v39 = vpop.eup %2889  ;;  %1965 = vst [vmem:[%s3692_s11 + $0x48] sm:$0xff] %v1949_v46  ;;  %v1935_v19 = vmul.f32 0.6931472, %v2888_v47 }
 0x730   :  { %1968 = vst [vmem:[%s3692_s11 + $0x60] sm:$0xff] %v1952_v48  ;;  %v1937_v49 = vmul.f32 0.6931472, %v2890_v39 }
 0x731   :  { %v1953_v50 = vsub.f32 %v3605_v36, %v1935_v19 }
 0x732   :  { %v2892_v52 = vpop.eup %2891  ;;  %v1954_v54 = vsub.f32 %v3610_v5, %v1937_v49 }
 0x733   :  { %1969 = vst [vmem:[%s3692_s11 + $0x68] sm:$0xff] %v1953_v50  ;;  %v1939_v24 = vmul.f32 0.6931472, %v2892_v52 }
 0x734   :  { %1970 = vst [vmem:[%s3692_s11 + $0x70] sm:$0xff] %v1954_v54 }
 0x735   :  { %v1955_v31 = vsub.f32 %v3613_v35, %v1939_v24 }
 0x737   :  { %1971 = vst [vmem:[%s3692_s11 + $0x78] sm:$0xff] %v1955_v31 }
 0x738   :  { %1976 = vsyncpa [#allocation3], 1 }
 0x739   :  { %1977 = vsyncpa [#allocation5], 1 }
 0x73a   :  { %1978 = vsyncpa [#allocation8], 1 }

</bundles_post_ra>
